<compile_context>
chip_gen: v6e
topology: v6e:2x2x1
jax: 0.10.0
libtpu: 0.0.40
codegen_flags: <defaults>
</compile_context>

<pallas_src>
import math

import jax
import jax.numpy as jnp
from jax import lax
from jax.experimental import pallas as pl
from jax.experimental.pallas import tpu as pltpu


# ------------- fused conv stack (BN folded) + ReLU + LSTM input projection -------------
def _make_conv_gates_kernel(n_layers, T, Tpad):
    def kernel(*refs):
        x_ref = refs[0]                                   # (1, T, E) bf16 embedding
        w_refs = refs[1:1 + n_layers]                     # (K, Cin, C) bf16, BN scale folded
        sh_refs = refs[1 + n_layers:1 + 2 * n_layers]     # (1, C) f32 BN shift
        wih_ref = refs[1 + 2 * n_layers]                  # (C, 8H) bf16, fwd|bwd concat
        b_ref = refs[2 + 2 * n_layers]                    # (1, 8H) f32
        o_ref = refs[3 + 2 * n_layers]                    # (1, 2, Tpad, 4H) bf16 gates
        padbuf = refs[4 + 2 * n_layers]                   # (T+K-1, Cmax) bf16 scratch

        E = x_ref.shape[2]
        K = w_refs[0].shape[0]
        pad = (K - 1) // 2
        C = w_refs[0].shape[2]
        G = o_ref.shape[3]
        Cmax = padbuf.shape[1]

        # Zero only the 2*pad halo rows (the 'same' padding) every step; the
        # interior rows are fully overwritten below.  Done unconditionally so
        # the kernel stays correct under megacore sharding of the batch axis.
        if pad > 0:
            padbuf[0:pad, :] = jnp.zeros((pad, Cmax), padbuf.dtype)
            padbuf[pad + T:T + K - 1, :] = jnp.zeros((K - 1 - pad, Cmax), padbuf.dtype)
        padbuf[pad:pad + T, :E] = x_ref[0]

        for w_ref, sh_ref in zip(w_refs, sh_refs):
            cin = w_ref.shape[1]
            # Accumulate the K tap partials as a value: one store per layer,
            # no f32 scratch read-modify-write passes.
            # TODO(synk): per-tap LHS slices start at non-multiple-of-8 sublane
            # offsets; a pltpu.roll-aligned im2col would also remove the
            # retiling copies and fold the taps into one MXU matmul.
            acc = jnp.dot(padbuf[0:T, :cin], w_ref[0],
                          preferred_element_type=jnp.float32)
            for k in range(1, K):                         # static tap unroll
                acc = acc + jnp.dot(padbuf[k:k + T, :cin], w_ref[k],
                                    preferred_element_type=jnp.float32)
            y = jnp.maximum(acc + sh_ref[...], 0.0)       # BN shift + ReLU (f32)
            padbuf[pad:pad + T, :C] = y.astype(padbuf.dtype)

        # Fused BiLSTM input projection: one (T, C) x (C, 8H) MXU matmul covers
        # both directions; stored bf16 in the layout kernel 2 consumes.
        act = padbuf[pad:pad + T, :C]
        gates = (jnp.dot(act, wih_ref[...], preferred_element_type=jnp.float32)
                 + b_ref[...]).astype(o_ref.dtype)        # (T, 8H) -> bf16
        o_ref[0, 0, :T, :] = gates[:, :G]
        o_ref[0, 1, :T, :] = gates[:, G:]
        if Tpad > T:                                      # zero the padded tail once
            o_ref[0, :, T:, :] = jnp.zeros((2, Tpad - T, G), o_ref.dtype)

    return kernel


def conv_gates(x_bte_bf16, conv_ws, conv_shifts, wih_cat, b_cat, Tpad,
               single_buffer_consts=True):
    B, T, E = x_bte_bf16.shape
    n_layers = len(conv_ws)
    K, _, C = conv_ws[0].shape
    G = wih_cat.shape[1] // 2                             # 4H per direction
    Cmax = max(E, C)

    def const_spec(shape):
        zero_idx = (0,) * len(shape)
        if single_buffer_consts:
            # Constant-index operands never change -> single buffer saves
            # half the resident-weight VMEM (matters at prod shapes on v7x).
            return pl.BlockSpec(shape, lambda b, _z=zero_idx: _z,
                                pipeline_mode=pl.Buffered(1))
        return pl.BlockSpec(shape, lambda b, _z=zero_idx: _z)

    in_specs = [pl.BlockSpec((1, T, E), lambda b: (b, 0, 0))]
    in_specs += [const_spec(w.shape) for w in conv_ws]
    in_specs += [const_spec(s.shape) for s in conv_shifts]
    in_specs += [const_spec(wih_cat.shape), const_spec(b_cat.shape)]

    return pl.pallas_call(
        _make_conv_gates_kernel(n_layers, T, Tpad),
        out_shape=jax.ShapeDtypeStruct((B, 2, Tpad, G), jnp.bfloat16),
        grid=(B,),
        in_specs=in_specs,
        out_specs=pl.BlockSpec((1, 2, Tpad, G), lambda b: (b, 0, 0, 0)),
        scratch_shapes=[pltpu.VMEM((T + K - 1, Cmax), jnp.bfloat16)],
        compiler_params=pltpu.CompilerParams(
            dimension_semantics=("parallel",),
            vmem_limit_bytes=64 * 1024 * 1024),
        # TODO(synk): for B == 1 inference on v7x, add a time-tile parallel
        # axis (K-1 halo) so both TensorCores get conv work.
    )(x_bte_bf16, *conv_ws, *conv_shifts, wih_cat, b_cat)


# ------------- BiLSTM recurrence over (direction, time-chunk) grid -------------
def _bilstm_chunk_kernel(len_ref, g_ref, whh_ref, o_ref, h_sc, c_sc, gt_sc):
    # len_ref: (B, 1) int32
    # g_ref:   (B, 1, chunkT, 4H) bf16 gate pre-acts (x@Wih + biases)
    # whh_ref: (1, H, 4H) bf16
    # o_ref:   (1, chunkT, B, H) f32
    # h_sc: (B, H) bf16   c_sc: (B, H) f32   gt_sc: (chunkT, B, 4H) f32
    chunkT = o_ref.shape[1]
    H = h_sc.shape[1]
    d = pl.program_id(0)                                  # 0 = forward, 1 = backward
    tb = pl.program_id(1)
    nT = pl.num_programs(1)

    @pl.when(tb == 0)
    def _():
        h_sc[...] = jnp.zeros_like(h_sc)
        c_sc[...] = jnp.zeros_like(c_sc)

    # One relayout per chunk: batch-major bf16 HBM block -> time-major f32
    # scratch, so per-step gate loads are contiguous (B, 4H) slabs.
    gt_sc[...] = jnp.transpose(g_ref[:, 0].astype(jnp.float32), (1, 0, 2))

    chunk = tb + d * (nT - 1 - 2 * tb)                    # time-ordered chunk index
    base = chunk * chunkT
    # TODO(synk): lens could ride SMEM via PrefetchScalarGridSpec; kept as a
    # one-vreg VMEM block hoisted out of the loop.
    lens = len_ref[...]                                   # (B, 1) int32

    def step(s, carry):
        s_eff = s + d * (chunkT - 1 - 2 * s)              # reversed in-chunk if d == 1
        t_glob = base + s_eff
        m = t_glob < lens                                 # pack_padded mask (B, 1)
        gx = gt_sc[s_eff]                                 # (B, 4H) f32
        # TODO(synk): hold Whh resident in MXU staging regs (matmul_push_rhs)
        # to avoid re-staging the RHS every timestep on v6e/v7x.
        g = gx + jnp.dot(h_sc[...], whh_ref[0],
                         preferred_element_type=jnp.float32)
        i = jax.nn.sigmoid(g[:, 0:H])
        f = jax.nn.sigmoid(g[:, H:2 * H])
        gg = jnp.tanh(g[:, 2 * H:3 * H])
        o = jax.nn.sigmoid(g[:, 3 * H:4 * H])
        c_new = f * c_sc[...] + i * gg
        h_new = o * jnp.tanh(c_new)
        h_sc[...] = jnp.where(m, h_new.astype(h_sc.dtype), h_sc[...])
        c_sc[...] = jnp.where(m, c_new, c_sc[...])
        o_ref[0, s_eff] = jnp.where(m, h_new, 0.0)
        return carry

    lax.fori_loop(0, chunkT, step, 0, unroll=4)


def bilstm_from_gates(gates, whh_stack, ilens, T, t_chunk):
    # gates: (B, 2, Tpad, 4H) bf16 precomputed x @ Wih + (b_ih + b_hh)
    B, _, Tpad, G = gates.shape
    H = G // 4
    nT = Tpad // t_chunk
    lens = ilens.astype(jnp.int32).reshape(B, 1)

    def time_blk(d, t):                                   # reversed chunk order for d == 1
        return t + d * (nT - 1 - 2 * t)

    out = pl.pallas_call(
        _bilstm_chunk_kernel,
        out_shape=jax.ShapeDtypeStruct((2, Tpad, B, H), jnp.float32),
        grid=(2, nT),
        in_specs=[
            pl.BlockSpec((B, 1), lambda d, t: (0, 0)),
            pl.BlockSpec((B, 1, t_chunk, G), lambda d, t: (0, d, time_blk(d, t), 0)),
            pl.BlockSpec((1, H, G), lambda d, t: (d, 0, 0)),
        ],
        out_specs=pl.BlockSpec((1, t_chunk, B, H),
                               lambda d, t: (d, time_blk(d, t), 0, 0)),
        scratch_shapes=[pltpu.VMEM((B, H), jnp.bfloat16),       # h (matmul-operand dtype)
                        pltpu.VMEM((B, H), jnp.float32),        # c
                        pltpu.VMEM((t_chunk, B, G), jnp.float32)],  # time-major gate chunk
        compiler_params=pltpu.CompilerParams(
            dimension_semantics=("parallel", "arbitrary"),
            vmem_limit_bytes=64 * 1024 * 1024),
    )(lens, gates, whh_stack)

    out = out[:, :T]                                      # (2, T, B, H)
    # (fwd, bwd) -> (B, T, 2H); small final relayout kept host-side.
    return jnp.transpose(out, (2, 1, 0, 3)).reshape(B, T, 2 * H)


# ---------------- parameter prep (bf16 matmul operands, folded BN) ----------------
def prepare_kernel_params(params):
    conv_ws = [(lp["w"] * lp["scale"]).astype(jnp.bfloat16) for lp in params["convs"]]
    conv_shifts = [lp["shift"] for lp in params["convs"]]
    lstm = params["lstm"]
    wih_cat = jnp.concatenate([lstm["wih_f"], lstm["wih_b"]], axis=1).astype(jnp.bfloat16)
    b_cat = jnp.concatenate([lstm["b_f"], lstm["b_b"]], axis=1)
    whh_stack = jnp.stack([lstm["whh_f"], lstm["whh_b"]]).astype(jnp.bfloat16)
    return dict(conv_ws=conv_ws, conv_shifts=conv_shifts,
                wih_cat=wih_cat, b_cat=b_cat, whh_stack=whh_stack)


# ---------------- Encoder forward (glue) ----------------
def encoder_forward(xs_ids, ilens, params, t_chunk=None):
    kp = prepare_kernel_params(params)
    x = params["embed"][xs_ids].astype(jnp.bfloat16)      # embedding lookup (B, T, E)
    B, T, _ = x.shape

    if t_chunk is None:
        # 128 is a good default on v5e/v6e; keep <=64 (or bf16 gates, as here)
        # under v7x's 64 MiB VMEM budget at large B.
        t_chunk = min(128, int(pl.cdiv(T, 8)) * 8)
    t_chunk = int(pl.cdiv(t_chunk, 8)) * 8                # sublane-aligned chunks
    Tpad = int(pl.cdiv(T, t_chunk)) * t_chunk

    try:
        gates = conv_gates(x, kp["conv_ws"], kp["conv_shifts"],
                           kp["wih_cat"], kp["b_cat"], Tpad,
                           single_buffer_consts=True)
    except Exception:
        # TODO(synk): pl.Buffered(1) single-buffering not supported by this JAX
        # version; fall back to default double-buffered constant operands.
        gates = conv_gates(x, kp["conv_ws"], kp["conv_shifts"],
                           kp["wih_cat"], kp["b_cat"], Tpad,
                           single_buffer_consts=False)

    out = bilstm_from_gates(gates, kp["whh_stack"], ilens, T, t_chunk)
    hlens = ilens                                         # pad_packed returns ilens
    return out, hlens


# ---------------- Deterministic parameter init ----------------
def init_params(key, idim, embed_dim, econv_chans, econv_filts, econv_layers, eunits):
    H = eunits // 2
    keys = jax.random.split(key, econv_layers + 2)
    embed = jax.random.normal(keys[0], (idim, embed_dim), jnp.float32)
    embed = embed.at[0].set(0.0)                          # padding_idx=0
    convs = []
    for layer in range(econv_layers):
        cin = embed_dim if layer == 0 else econv_chans
        gain = math.sqrt(2.0)                             # calculate_gain('relu')
        limit = gain * math.sqrt(6.0 / (cin * econv_filts + econv_chans * econv_filts))
        w = jax.random.uniform(keys[1 + layer], (econv_filts, cin, econv_chans),
                               jnp.float32, -limit, limit)
        gamma = jnp.ones((econv_chans,), jnp.float32)
        beta = jnp.zeros((econv_chans,), jnp.float32)
        rmean = jnp.zeros((econv_chans,), jnp.float32)
        rvar = jnp.ones((econv_chans,), jnp.float32)
        eps = 1e-5
        scale = (gamma / jnp.sqrt(rvar + eps)).reshape(1, econv_chans)
        shift = (beta - rmean * gamma / jnp.sqrt(rvar + eps)).reshape(1, econv_chans)
        convs.append(dict(w=w, scale=scale, shift=shift))
    bound = 1.0 / math.sqrt(H)
    lk = jax.random.split(keys[-1], 8)

    def u(k, shape):
        return jax.random.uniform(k, shape, jnp.float32, -bound, bound)

    lstm = dict(
        wih_f=u(lk[0], (econv_chans, 4 * H)), whh_f=u(lk[1], (H, 4 * H)),
        b_f=(u(lk[2], (4 * H,)) + u(lk[3], (4 * H,))).reshape(1, 4 * H),
        wih_b=u(lk[4], (econv_chans, 4 * H)), whh_b=u(lk[5], (H, 4 * H)),
        b_b=(u(lk[6], (4 * H,)) + u(lk[7], (4 * H,))).reshape(1, 4 * H),
    )
    return dict(embed=embed, convs=convs, lstm=lstm)


# ---------------- Pure-JAX f32 reference (for correctness check) ----------------
def reference_forward(xs_ids, ilens, params):
    x = params["embed"][xs_ids]
    for lp in params["convs"]:
        B, T, _ = x.shape
        K, _, Cout = lp["w"].shape
        pad = (K - 1) // 2
        xp = jnp.pad(x, ((0, 0), (pad, pad), (0, 0)))
        acc = jnp.zeros((B, T, Cout), jnp.float32)
        for k in range(K):
            acc = acc + jnp.einsum("bti,io->bto", xp[:, k:k + T, :], lp["w"][k],
                                   precision=jax.lax.Precision.HIGHEST)
        x = jnp.maximum(acc * lp["scale"] + lp["shift"], 0.0)

    T = x.shape[1]
    B = x.shape[0]
    H = params["lstm"]["whh_f"].shape[0]
    lens = ilens.astype(jnp.int32).reshape(B, 1)
    x_tbc = jnp.transpose(x, (1, 0, 2))

    def run_dir(wih, whh, b, reverse):
        def cell(carry, inp):
            h, c = carry
            x_t, t = inp
            g = (x_t @ wih + h @ whh + b)
            i = jax.nn.sigmoid(g[:, :H]); f = jax.nn.sigmoid(g[:, H:2 * H])
            gg = jnp.tanh(g[:, 2 * H:3 * H]); o = jax.nn.sigmoid(g[:, 3 * H:])
            c_new = f * c + i * gg
            h_new = o * jnp.tanh(c_new)
            m = t < lens
            h = jnp.where(m, h_new, h); c = jnp.where(m, c_new, c)
            return (h, c), jnp.where(m, h_new, 0.0)
        ts = jnp.arange(T)
        xs = (x_tbc[::-1], ts[::-1]) if reverse else (x_tbc, ts)
        init = (jnp.zeros((B, H), jnp.float32), jnp.zeros((B, H), jnp.float32))
        _, outs = lax.scan(cell, init, xs)
        return outs[::-1] if reverse else outs

    lp = params["lstm"]
    of = run_dir(lp["wih_f"], lp["whh_f"], lp["b_f"], False)
    ob = run_dir(lp["wih_b"], lp["whh_b"], lp["b_b"], True)
    out = jnp.concatenate([of, ob], axis=-1)
    return jnp.transpose(out, (1, 0, 2)), ilens


if __name__ == "__main__":
    # Small config consistent with the module: idim(vocab)=10, embed_dim=32,
    # econv_layers=3, econv_chans=32, econv_filts=5, elayers=1, eunits=32.
    B, T = 2, 12
    idim, embed_dim, econv_chans, econv_filts, econv_layers, eunits = 10, 32, 32, 5, 3, 32

    key = jax.random.PRNGKey(0)
    kparam, kx = jax.random.split(key)
    params = init_params(kparam, idim, embed_dim, econv_chans, econv_filts,
                         econv_layers, eunits)

    ilens = jnp.array([12, 9], dtype=jnp.int32)           # sorted descending, max == T
    xs = jax.random.randint(kx, (B, T), 1, idim, dtype=jnp.int32)
    # zero-pad tokens beyond each length (padding id = 0)
    t_idx = jnp.arange(T)[None, :]
    xs = jnp.where(t_idx < ilens[:, None], xs, 0)

    # t_chunk=8 with T=12 -> Tpad=16, 2 time chunks: exercises chunk-carried
    # state, reversed chunk ordering for the backward direction, and the
    # zero-filled padded tail written by kernel 1.
    out, hlens = encoder_forward(xs, ilens, params, t_chunk=8)
    out = jax.block_until_ready(out)

    ref_out, ref_hlens = reference_forward(xs, ilens, params)

    assert out.shape == (B, T, eunits), out.shape
    assert out.dtype == jnp.float32
    assert bool(jnp.all(jnp.isfinite(out)))
    assert bool(jnp.all(hlens == ref_hlens))
    # bf16 conv weights/activations + bf16 gate intermediate vs f32 reference.
    err = float(jnp.max(jnp.abs(out - ref_out)))
    assert bool(jnp.allclose(out, ref_out, rtol=4e-2, atol=4e-2)), err

    print("KERNEL_OK")
</pallas_src>

<mosaic_0001>
module attributes {stable_mosaic.version = 11 : i64} {
  func.func @kernel(%arg0: i32, %arg1: memref<1x12x32xbf16, #tpu.memory_space<vmem>>, %arg2: memref<5x32x32xbf16, #tpu.memory_space<vmem>>, %arg3: memref<5x32x32xbf16, #tpu.memory_space<vmem>>, %arg4: memref<5x32x32xbf16, #tpu.memory_space<vmem>>, %arg5: memref<1x32xf32, #tpu.memory_space<vmem>>, %arg6: memref<1x32xf32, #tpu.memory_space<vmem>>, %arg7: memref<1x32xf32, #tpu.memory_space<vmem>>, %arg8: memref<32x128xbf16, #tpu.memory_space<vmem>>, %arg9: memref<1x128xf32, #tpu.memory_space<vmem>>, %arg10: memref<1x2x16x64xbf16, #tpu.memory_space<vmem>>, %arg11: memref<16x32xbf16, #tpu.memory_space<vmem>>) attributes {dimension_semantics = [#tpu.dimension_semantics<parallel>], iteration_bounds = array<i64: 2>, scalar_prefetch = 0 : i64, scratch_operands = 1 : i64, tpu.core_type = #tpu.core_type<tc>, window_params = [{transform_indices = @transform_0, window_bounds = array<i64: 1, 12, 32>}, {pipeline_mode = #tpu.pipeline_mode<synchronous>, transform_indices = @transform_1, window_bounds = array<i64: 5, 32, 32>}, {pipeline_mode = #tpu.pipeline_mode<synchronous>, transform_indices = @transform_2, window_bounds = array<i64: 5, 32, 32>}, {pipeline_mode = #tpu.pipeline_mode<synchronous>, transform_indices = @transform_3, window_bounds = array<i64: 5, 32, 32>}, {pipeline_mode = #tpu.pipeline_mode<synchronous>, transform_indices = @transform_4, window_bounds = array<i64: 1, 32>}, {pipeline_mode = #tpu.pipeline_mode<synchronous>, transform_indices = @transform_5, window_bounds = array<i64: 1, 32>}, {pipeline_mode = #tpu.pipeline_mode<synchronous>, transform_indices = @transform_6, window_bounds = array<i64: 1, 32>}, {pipeline_mode = #tpu.pipeline_mode<synchronous>, transform_indices = @transform_7, window_bounds = array<i64: 32, 128>}, {pipeline_mode = #tpu.pipeline_mode<synchronous>, transform_indices = @transform_8, window_bounds = array<i64: 1, 128>}, {transform_indices = @transform_9, window_bounds = array<i64: 1, 2, 16, 64>}]} {
    %cst = arith.constant 0.000000e+00 : bf16
    %0 = vector.broadcast %cst : bf16 to vector<2x32xbf16>
    %c0 = arith.constant 0 : index
    %c0_0 = arith.constant 0 : index
    %1 = vector.load %arg11[%c0, %c0_0] : memref<16x32xbf16, #tpu.memory_space<vmem>>, vector<2x32xbf16>
    tpu.vector_store %arg11[%c0, %c0_0], %0 {strides = array<i32>} : memref<16x32xbf16, #tpu.memory_space<vmem>>, vector<2x32xbf16>,
    %cst_1 = arith.constant 0.000000e+00 : bf16
    %2 = vector.broadcast %cst_1 : bf16 to vector<2x32xbf16>
    %c14 = arith.constant 14 : index
    %c0_2 = arith.constant 0 : index
    %3 = vector.load %arg11[%c14, %c0_2] : memref<16x32xbf16, #tpu.memory_space<vmem>>, vector<2x32xbf16>
    tpu.vector_store %arg11[%c14, %c0_2], %2 {strides = array<i32>} : memref<16x32xbf16, #tpu.memory_space<vmem>>, vector<2x32xbf16>,
    %c0_3 = arith.constant 0 : index
    %c0_4 = arith.constant 0 : index
    %c0_5 = arith.constant 0 : index
    %4 = vector.load %arg1[%c0_3, %c0_4, %c0_5] : memref<1x12x32xbf16, #tpu.memory_space<vmem>>, vector<1x12x32xbf16>
    %5 = vector.shape_cast %4 : vector<1x12x32xbf16> to vector<12x32xbf16>
    %c2 = arith.constant 2 : index
    %c0_6 = arith.constant 0 : index
    %6 = vector.load %arg11[%c2, %c0_6] : memref<16x32xbf16, #tpu.memory_space<vmem>>, vector<12x32xbf16>
    tpu.vector_store %arg11[%c2, %c0_6], %5 {strides = array<i32>} : memref<16x32xbf16, #tpu.memory_space<vmem>>, vector<12x32xbf16>,
    %c0_7 = arith.constant 0 : index
    %c0_8 = arith.constant 0 : index
    %7 = vector.load %arg11[%c0_7, %c0_8] : memref<16x32xbf16, #tpu.memory_space<vmem>>, vector<12x32xbf16>
    %c0_9 = arith.constant 0 : index
    %c0_10 = arith.constant 0 : index
    %c0_11 = arith.constant 0 : index
    %8 = vector.load %arg2[%c0_9, %c0_10, %c0_11] : memref<5x32x32xbf16, #tpu.memory_space<vmem>>, vector<1x32x32xbf16>
    %9 = vector.shape_cast %8 : vector<1x32x32xbf16> to vector<32x32xbf16>
    %cst_12 = arith.constant dense<0.000000e+00> : vector<12x32xf32>
    %10 = tpu.matmul %7, %9, %cst_12 {dimension_numbers = #tpu.dot_dimension_numbers<[1], [0], [0], [1], [0, 0, 1, 1], [], []>} : vector<12x32xbf16>, vector<32x32xbf16>, vector<12x32xf32> -> vector<12x32xf32>
    %c1 = arith.constant 1 : index
    %c0_13 = arith.constant 0 : index
    %11 = vector.load %arg11[%c1, %c0_13] : memref<16x32xbf16, #tpu.memory_space<vmem>>, vector<12x32xbf16>
    %c1_14 = arith.constant 1 : index
    %c0_15 = arith.constant 0 : index
    %c0_16 = arith.constant 0 : index
    %12 = vector.load %arg2[%c1_14, %c0_15, %c0_16] : memref<5x32x32xbf16, #tpu.memory_space<vmem>>, vector<1x32x32xbf16>
    %13 = vector.shape_cast %12 : vector<1x32x32xbf16> to vector<32x32xbf16>
    %cst_17 = arith.constant dense<0.000000e+00> : vector<12x32xf32>
    %14 = tpu.matmul %11, %13, %cst_17 {dimension_numbers = #tpu.dot_dimension_numbers<[1], [0], [0], [1], [0, 0, 1, 1], [], []>} : vector<12x32xbf16>, vector<32x32xbf16>, vector<12x32xf32> -> vector<12x32xf32>
    %15 = arith.addf %10, %14 : vector<12x32xf32>
    %c2_18 = arith.constant 2 : index
    %c0_19 = arith.constant 0 : index
    %16 = vector.load %arg11[%c2_18, %c0_19] : memref<16x32xbf16, #tpu.memory_space<vmem>>, vector<12x32xbf16>
    %c2_20 = arith.constant 2 : index
    %c0_21 = arith.constant 0 : index
    %c0_22 = arith.constant 0 : index
    %17 = vector.load %arg2[%c2_20, %c0_21, %c0_22] : memref<5x32x32xbf16, #tpu.memory_space<vmem>>, vector<1x32x32xbf16>
    %18 = vector.shape_cast %17 : vector<1x32x32xbf16> to vector<32x32xbf16>
    %cst_23 = arith.constant dense<0.000000e+00> : vector<12x32xf32>
    %19 = tpu.matmul %16, %18, %cst_23 {dimension_numbers = #tpu.dot_dimension_numbers<[1], [0], [0], [1], [0, 0, 1, 1], [], []>} : vector<12x32xbf16>, vector<32x32xbf16>, vector<12x32xf32> -> vector<12x32xf32>
    %20 = arith.addf %15, %19 : vector<12x32xf32>
    %c3 = arith.constant 3 : index
    %c0_24 = arith.constant 0 : index
    %21 = vector.load %arg11[%c3, %c0_24] : memref<16x32xbf16, #tpu.memory_space<vmem>>, vector<12x32xbf16>
    %c3_25 = arith.constant 3 : index
    %c0_26 = arith.constant 0 : index
    %c0_27 = arith.constant 0 : index
    %22 = vector.load %arg2[%c3_25, %c0_26, %c0_27] : memref<5x32x32xbf16, #tpu.memory_space<vmem>>, vector<1x32x32xbf16>
    %23 = vector.shape_cast %22 : vector<1x32x32xbf16> to vector<32x32xbf16>
    %cst_28 = arith.constant dense<0.000000e+00> : vector<12x32xf32>
    %24 = tpu.matmul %21, %23, %cst_28 {dimension_numbers = #tpu.dot_dimension_numbers<[1], [0], [0], [1], [0, 0, 1, 1], [], []>} : vector<12x32xbf16>, vector<32x32xbf16>, vector<12x32xf32> -> vector<12x32xf32>
    %25 = arith.addf %20, %24 : vector<12x32xf32>
    %c4 = arith.constant 4 : index
    %c0_29 = arith.constant 0 : index
    %26 = vector.load %arg11[%c4, %c0_29] : memref<16x32xbf16, #tpu.memory_space<vmem>>, vector<12x32xbf16>
    %c4_30 = arith.constant 4 : index
    %c0_31 = arith.constant 0 : index
    %c0_32 = arith.constant 0 : index
    %27 = vector.load %arg2[%c4_30, %c0_31, %c0_32] : memref<5x32x32xbf16, #tpu.memory_space<vmem>>, vector<1x32x32xbf16>
    %28 = vector.shape_cast %27 : vector<1x32x32xbf16> to vector<32x32xbf16>
    %cst_33 = arith.constant dense<0.000000e+00> : vector<12x32xf32>
    %29 = tpu.matmul %26, %28, %cst_33 {dimension_numbers = #tpu.dot_dimension_numbers<[1], [0], [0], [1], [0, 0, 1, 1], [], []>} : vector<12x32xbf16>, vector<32x32xbf16>, vector<12x32xf32> -> vector<12x32xf32>
    %30 = arith.addf %25, %29 : vector<12x32xf32>
    %c0_34 = arith.constant 0 : index
    %c0_35 = arith.constant 0 : index
    %31 = vector.load %arg5[%c0_34, %c0_35] : memref<1x32xf32, #tpu.memory_space<vmem>>, vector<1x32xf32>
    %32 = vector.broadcast %31 : vector<1x32xf32> to vector<12x32xf32>
    %33 = arith.addf %30, %32 : vector<12x32xf32>
    %cst_36 = arith.constant 0.000000e+00 : f32
    %34 = vector.broadcast %cst_36 : f32 to vector<12x32xf32>
    %35 = arith.maximumf %33, %34 : vector<12x32xf32>
    %36 = arith.truncf %35 : vector<12x32xf32> to vector<12x32xbf16>
    %c2_37 = arith.constant 2 : index
    %c0_38 = arith.constant 0 : index
    %37 = vector.load %arg11[%c2_37, %c0_38] : memref<16x32xbf16, #tpu.memory_space<vmem>>, vector<12x32xbf16>
    tpu.vector_store %arg11[%c2_37, %c0_38], %36 {strides = array<i32>} : memref<16x32xbf16, #tpu.memory_space<vmem>>, vector<12x32xbf16>,
    %c0_39 = arith.constant 0 : index
    %c0_40 = arith.constant 0 : index
    %38 = vector.load %arg11[%c0_39, %c0_40] : memref<16x32xbf16, #tpu.memory_space<vmem>>, vector<12x32xbf16>
    %c0_41 = arith.constant 0 : index
    %c0_42 = arith.constant 0 : index
    %c0_43 = arith.constant 0 : index
    %39 = vector.load %arg3[%c0_41, %c0_42, %c0_43] : memref<5x32x32xbf16, #tpu.memory_space<vmem>>, vector<1x32x32xbf16>
    %40 = vector.shape_cast %39 : vector<1x32x32xbf16> to vector<32x32xbf16>
    %cst_44 = arith.constant dense<0.000000e+00> : vector<12x32xf32>
    %41 = tpu.matmul %38, %40, %cst_44 {dimension_numbers = #tpu.dot_dimension_numbers<[1], [0], [0], [1], [0, 0, 1, 1], [], []>} : vector<12x32xbf16>, vector<32x32xbf16>, vector<12x32xf32> -> vector<12x32xf32>
    %c1_45 = arith.constant 1 : index
    %c0_46 = arith.constant 0 : index
    %42 = vector.load %arg11[%c1_45, %c0_46] : memref<16x32xbf16, #tpu.memory_space<vmem>>, vector<12x32xbf16>
    %c1_47 = arith.constant 1 : index
    %c0_48 = arith.constant 0 : index
    %c0_49 = arith.constant 0 : index
    %43 = vector.load %arg3[%c1_47, %c0_48, %c0_49] : memref<5x32x32xbf16, #tpu.memory_space<vmem>>, vector<1x32x32xbf16>
    %44 = vector.shape_cast %43 : vector<1x32x32xbf16> to vector<32x32xbf16>
    %cst_50 = arith.constant dense<0.000000e+00> : vector<12x32xf32>
    %45 = tpu.matmul %42, %44, %cst_50 {dimension_numbers = #tpu.dot_dimension_numbers<[1], [0], [0], [1], [0, 0, 1, 1], [], []>} : vector<12x32xbf16>, vector<32x32xbf16>, vector<12x32xf32> -> vector<12x32xf32>
    %46 = arith.addf %41, %45 : vector<12x32xf32>
    %c2_51 = arith.constant 2 : index
    %c0_52 = arith.constant 0 : index
    %47 = vector.load %arg11[%c2_51, %c0_52] : memref<16x32xbf16, #tpu.memory_space<vmem>>, vector<12x32xbf16>
    %c2_53 = arith.constant 2 : index
    %c0_54 = arith.constant 0 : index
    %c0_55 = arith.constant 0 : index
    %48 = vector.load %arg3[%c2_53, %c0_54, %c0_55] : memref<5x32x32xbf16, #tpu.memory_space<vmem>>, vector<1x32x32xbf16>
    %49 = vector.shape_cast %48 : vector<1x32x32xbf16> to vector<32x32xbf16>
    %cst_56 = arith.constant dense<0.000000e+00> : vector<12x32xf32>
    %50 = tpu.matmul %47, %49, %cst_56 {dimension_numbers = #tpu.dot_dimension_numbers<[1], [0], [0], [1], [0, 0, 1, 1], [], []>} : vector<12x32xbf16>, vector<32x32xbf16>, vector<12x32xf32> -> vector<12x32xf32>
    %51 = arith.addf %46, %50 : vector<12x32xf32>
    %c3_57 = arith.constant 3 : index
    %c0_58 = arith.constant 0 : index
    %52 = vector.load %arg11[%c3_57, %c0_58] : memref<16x32xbf16, #tpu.memory_space<vmem>>, vector<12x32xbf16>
    %c3_59 = arith.constant 3 : index
    %c0_60 = arith.constant 0 : index
    %c0_61 = arith.constant 0 : index
    %53 = vector.load %arg3[%c3_59, %c0_60, %c0_61] : memref<5x32x32xbf16, #tpu.memory_space<vmem>>, vector<1x32x32xbf16>
    %54 = vector.shape_cast %53 : vector<1x32x32xbf16> to vector<32x32xbf16>
    %cst_62 = arith.constant dense<0.000000e+00> : vector<12x32xf32>
    %55 = tpu.matmul %52, %54, %cst_62 {dimension_numbers = #tpu.dot_dimension_numbers<[1], [0], [0], [1], [0, 0, 1, 1], [], []>} : vector<12x32xbf16>, vector<32x32xbf16>, vector<12x32xf32> -> vector<12x32xf32>
    %56 = arith.addf %51, %55 : vector<12x32xf32>
    %c4_63 = arith.constant 4 : index
    %c0_64 = arith.constant 0 : index
    %57 = vector.load %arg11[%c4_63, %c0_64] : memref<16x32xbf16, #tpu.memory_space<vmem>>, vector<12x32xbf16>
    %c4_65 = arith.constant 4 : index
    %c0_66 = arith.constant 0 : index
    %c0_67 = arith.constant 0 : index
    %58 = vector.load %arg3[%c4_65, %c0_66, %c0_67] : memref<5x32x32xbf16, #tpu.memory_space<vmem>>, vector<1x32x32xbf16>
    %59 = vector.shape_cast %58 : vector<1x32x32xbf16> to vector<32x32xbf16>
    %cst_68 = arith.constant dense<0.000000e+00> : vector<12x32xf32>
    %60 = tpu.matmul %57, %59, %cst_68 {dimension_numbers = #tpu.dot_dimension_numbers<[1], [0], [0], [1], [0, 0, 1, 1], [], []>} : vector<12x32xbf16>, vector<32x32xbf16>, vector<12x32xf32> -> vector<12x32xf32>
    %61 = arith.addf %56, %60 : vector<12x32xf32>
    %c0_69 = arith.constant 0 : index
    %c0_70 = arith.constant 0 : index
    %62 = vector.load %arg6[%c0_69, %c0_70] : memref<1x32xf32, #tpu.memory_space<vmem>>, vector<1x32xf32>
    %63 = vector.broadcast %62 : vector<1x32xf32> to vector<12x32xf32>
    %64 = arith.addf %61, %63 : vector<12x32xf32>
    %cst_71 = arith.constant 0.000000e+00 : f32
    %65 = vector.broadcast %cst_71 : f32 to vector<12x32xf32>
    %66 = arith.maximumf %64, %65 : vector<12x32xf32>
    %67 = arith.truncf %66 : vector<12x32xf32> to vector<12x32xbf16>
    %c2_72 = arith.constant 2 : index
    %c0_73 = arith.constant 0 : index
    %68 = vector.load %arg11[%c2_72, %c0_73] : memref<16x32xbf16, #tpu.memory_space<vmem>>, vector<12x32xbf16>
    tpu.vector_store %arg11[%c2_72, %c0_73], %67 {strides = array<i32>} : memref<16x32xbf16, #tpu.memory_space<vmem>>, vector<12x32xbf16>,
    %c0_74 = arith.constant 0 : index
    %c0_75 = arith.constant 0 : index
    %69 = vector.load %arg11[%c0_74, %c0_75] : memref<16x32xbf16, #tpu.memory_space<vmem>>, vector<12x32xbf16>
    %c0_76 = arith.constant 0 : index
    %c0_77 = arith.constant 0 : index
    %c0_78 = arith.constant 0 : index
    %70 = vector.load %arg4[%c0_76, %c0_77, %c0_78] : memref<5x32x32xbf16, #tpu.memory_space<vmem>>, vector<1x32x32xbf16>
    %71 = vector.shape_cast %70 : vector<1x32x32xbf16> to vector<32x32xbf16>
    %cst_79 = arith.constant dense<0.000000e+00> : vector<12x32xf32>
    %72 = tpu.matmul %69, %71, %cst_79 {dimension_numbers = #tpu.dot_dimension_numbers<[1], [0], [0], [1], [0, 0, 1, 1], [], []>} : vector<12x32xbf16>, vector<32x32xbf16>, vector<12x32xf32> -> vector<12x32xf32>
    %c1_80 = arith.constant 1 : index
    %c0_81 = arith.constant 0 : index
    %73 = vector.load %arg11[%c1_80, %c0_81] : memref<16x32xbf16, #tpu.memory_space<vmem>>, vector<12x32xbf16>
    %c1_82 = arith.constant 1 : index
    %c0_83 = arith.constant 0 : index
    %c0_84 = arith.constant 0 : index
    %74 = vector.load %arg4[%c1_82, %c0_83, %c0_84] : memref<5x32x32xbf16, #tpu.memory_space<vmem>>, vector<1x32x32xbf16>
    %75 = vector.shape_cast %74 : vector<1x32x32xbf16> to vector<32x32xbf16>
    %cst_85 = arith.constant dense<0.000000e+00> : vector<12x32xf32>
    %76 = tpu.matmul %73, %75, %cst_85 {dimension_numbers = #tpu.dot_dimension_numbers<[1], [0], [0], [1], [0, 0, 1, 1], [], []>} : vector<12x32xbf16>, vector<32x32xbf16>, vector<12x32xf32> -> vector<12x32xf32>
    %77 = arith.addf %72, %76 : vector<12x32xf32>
    %c2_86 = arith.constant 2 : index
    %c0_87 = arith.constant 0 : index
    %78 = vector.load %arg11[%c2_86, %c0_87] : memref<16x32xbf16, #tpu.memory_space<vmem>>, vector<12x32xbf16>
    %c2_88 = arith.constant 2 : index
    %c0_89 = arith.constant 0 : index
    %c0_90 = arith.constant 0 : index
    %79 = vector.load %arg4[%c2_88, %c0_89, %c0_90] : memref<5x32x32xbf16, #tpu.memory_space<vmem>>, vector<1x32x32xbf16>
    %80 = vector.shape_cast %79 : vector<1x32x32xbf16> to vector<32x32xbf16>
    %cst_91 = arith.constant dense<0.000000e+00> : vector<12x32xf32>
    %81 = tpu.matmul %78, %80, %cst_91 {dimension_numbers = #tpu.dot_dimension_numbers<[1], [0], [0], [1], [0, 0, 1, 1], [], []>} : vector<12x32xbf16>, vector<32x32xbf16>, vector<12x32xf32> -> vector<12x32xf32>
    %82 = arith.addf %77, %81 : vector<12x32xf32>
    %c3_92 = arith.constant 3 : index
    %c0_93 = arith.constant 0 : index
    %83 = vector.load %arg11[%c3_92, %c0_93] : memref<16x32xbf16, #tpu.memory_space<vmem>>, vector<12x32xbf16>
    %c3_94 = arith.constant 3 : index
    %c0_95 = arith.constant 0 : index
    %c0_96 = arith.constant 0 : index
    %84 = vector.load %arg4[%c3_94, %c0_95, %c0_96] : memref<5x32x32xbf16, #tpu.memory_space<vmem>>, vector<1x32x32xbf16>
    %85 = vector.shape_cast %84 : vector<1x32x32xbf16> to vector<32x32xbf16>
    %cst_97 = arith.constant dense<0.000000e+00> : vector<12x32xf32>
    %86 = tpu.matmul %83, %85, %cst_97 {dimension_numbers = #tpu.dot_dimension_numbers<[1], [0], [0], [1], [0, 0, 1, 1], [], []>} : vector<12x32xbf16>, vector<32x32xbf16>, vector<12x32xf32> -> vector<12x32xf32>
    %87 = arith.addf %82, %86 : vector<12x32xf32>
    %c4_98 = arith.constant 4 : index
    %c0_99 = arith.constant 0 : index
    %88 = vector.load %arg11[%c4_98, %c0_99] : memref<16x32xbf16, #tpu.memory_space<vmem>>, vector<12x32xbf16>
    %c4_100 = arith.constant 4 : index
    %c0_101 = arith.constant 0 : index
    %c0_102 = arith.constant 0 : index
    %89 = vector.load %arg4[%c4_100, %c0_101, %c0_102] : memref<5x32x32xbf16, #tpu.memory_space<vmem>>, vector<1x32x32xbf16>
    %90 = vector.shape_cast %89 : vector<1x32x32xbf16> to vector<32x32xbf16>
    %cst_103 = arith.constant dense<0.000000e+00> : vector<12x32xf32>
    %91 = tpu.matmul %88, %90, %cst_103 {dimension_numbers = #tpu.dot_dimension_numbers<[1], [0], [0], [1], [0, 0, 1, 1], [], []>} : vector<12x32xbf16>, vector<32x32xbf16>, vector<12x32xf32> -> vector<12x32xf32>
    %92 = arith.addf %87, %91 : vector<12x32xf32>
    %c0_104 = arith.constant 0 : index
    %c0_105 = arith.constant 0 : index
    %93 = vector.load %arg7[%c0_104, %c0_105] : memref<1x32xf32, #tpu.memory_space<vmem>>, vector<1x32xf32>
    %94 = vector.broadcast %93 : vector<1x32xf32> to vector<12x32xf32>
    %95 = arith.addf %92, %94 : vector<12x32xf32>
    %cst_106 = arith.constant 0.000000e+00 : f32
    %96 = vector.broadcast %cst_106 : f32 to vector<12x32xf32>
    %97 = arith.maximumf %95, %96 : vector<12x32xf32>
    %98 = arith.truncf %97 : vector<12x32xf32> to vector<12x32xbf16>
    %c2_107 = arith.constant 2 : index
    %c0_108 = arith.constant 0 : index
    %99 = vector.load %arg11[%c2_107, %c0_108] : memref<16x32xbf16, #tpu.memory_space<vmem>>, vector<12x32xbf16>
    tpu.vector_store %arg11[%c2_107, %c0_108], %98 {strides = array<i32>} : memref<16x32xbf16, #tpu.memory_space<vmem>>, vector<12x32xbf16>,
    %c2_109 = arith.constant 2 : index
    %c0_110 = arith.constant 0 : index
    %100 = vector.load %arg11[%c2_109, %c0_110] : memref<16x32xbf16, #tpu.memory_space<vmem>>, vector<12x32xbf16>
    %c0_111 = arith.constant 0 : index
    %c0_112 = arith.constant 0 : index
    %101 = vector.load %arg8[%c0_111, %c0_112] : memref<32x128xbf16, #tpu.memory_space<vmem>>, vector<32x128xbf16>
    %cst_113 = arith.constant dense<0.000000e+00> : vector<12x128xf32>
    %102 = tpu.matmul %100, %101, %cst_113 {dimension_numbers = #tpu.dot_dimension_numbers<[1], [0], [0], [1], [0, 0, 1, 1], [], []>} : vector<12x32xbf16>, vector<32x128xbf16>, vector<12x128xf32> -> vector<12x128xf32>
    %c0_114 = arith.constant 0 : index
    %c0_115 = arith.constant 0 : index
    %103 = vector.load %arg9[%c0_114, %c0_115] : memref<1x128xf32, #tpu.memory_space<vmem>>, vector<1x128xf32>
    %104 = vector.broadcast %103 : vector<1x128xf32> to vector<12x128xf32>
    %105 = arith.addf %102, %104 : vector<12x128xf32>
    %106 = arith.truncf %105 : vector<12x128xf32> to vector<12x128xbf16>
    %107 = vector.extract_strided_slice %106 {offsets = [0, 0], sizes = [12, 64], strides = [1, 1]} : vector<12x128xbf16> to vector<12x64xbf16>
    %c0_116 = arith.constant 0 : index
    %c0_117 = arith.constant 0 : index
    %c0_118 = arith.constant 0 : index
    %c0_119 = arith.constant 0 : index
    %108 = vector.load %arg10[%c0_116, %c0_117, %c0_118, %c0_119] : memref<1x2x16x64xbf16, #tpu.memory_space<vmem>>, vector<1x1x12x64xbf16>
    %109 = vector.shape_cast %108 : vector<1x1x12x64xbf16> to vector<12x64xbf16>
    %110 = vector.shape_cast %107 : vector<12x64xbf16> to vector<1x1x12x64xbf16>
    tpu.vector_store %arg10[%c0_116, %c0_117, %c0_118, %c0_119], %110 {strides = array<i32>} : memref<1x2x16x64xbf16, #tpu.memory_space<vmem>>, vector<1x1x12x64xbf16>,
    %111 = vector.extract_strided_slice %106 {offsets = [0, 64], sizes = [12, 64], strides = [1, 1]} : vector<12x128xbf16> to vector<12x64xbf16>
    %c0_120 = arith.constant 0 : index
    %c1_121 = arith.constant 1 : index
    %c0_122 = arith.constant 0 : index
    %c0_123 = arith.constant 0 : index
    %112 = vector.load %arg10[%c0_120, %c1_121, %c0_122, %c0_123] : memref<1x2x16x64xbf16, #tpu.memory_space<vmem>>, vector<1x1x12x64xbf16>
    %113 = vector.shape_cast %112 : vector<1x1x12x64xbf16> to vector<12x64xbf16>
    %114 = vector.shape_cast %111 : vector<12x64xbf16> to vector<1x1x12x64xbf16>
    tpu.vector_store %arg10[%c0_120, %c1_121, %c0_122, %c0_123], %114 {strides = array<i32>} : memref<1x2x16x64xbf16, #tpu.memory_space<vmem>>, vector<1x1x12x64xbf16>,
    %cst_124 = arith.constant 0.000000e+00 : bf16
    %115 = vector.broadcast %cst_124 : bf16 to vector<2x4x64xbf16>
    %c0_125 = arith.constant 0 : index
    %c0_126 = arith.constant 0 : index
    %c12 = arith.constant 12 : index
    %c0_127 = arith.constant 0 : index
    %116 = vector.load %arg10[%c0_125, %c0_126, %c12, %c0_127] : memref<1x2x16x64xbf16, #tpu.memory_space<vmem>>, vector<1x2x4x64xbf16>
    %117 = vector.shape_cast %116 : vector<1x2x4x64xbf16> to vector<2x4x64xbf16>
    %118 = vector.shape_cast %115 : vector<2x4x64xbf16> to vector<1x2x4x64xbf16>
    tpu.vector_store %arg10[%c0_125, %c0_126, %c12, %c0_127], %118 {strides = array<i32>} : memref<1x2x16x64xbf16, #tpu.memory_space<vmem>>, vector<1x2x4x64xbf16>,
    return
  }
  func.func @transform_0(%arg0: i32) -> (i32, i32, i32) {
    %c0_i32 = arith.constant 0 : i32
    %c0_i32_0 = arith.constant 0 : i32
    %c0_i32_1 = arith.constant 0 : i32
    return %arg0, %c0_i32, %c0_i32_0 : i32, i32, i32
  }
  func.func @transform_1(%arg0: i32) -> (i32, i32, i32) {
    %c0_i32 = arith.constant 0 : i32
    %c0_i32_0 = arith.constant 0 : i32
    %c0_i32_1 = arith.constant 0 : i32
    %c0_i32_2 = arith.constant 0 : i32
    return %c0_i32, %c0_i32_0, %c0_i32_1 : i32, i32, i32
  }
  func.func @transform_2(%arg0: i32) -> (i32, i32, i32) {
    %c0_i32 = arith.constant 0 : i32
    %c0_i32_0 = arith.constant 0 : i32
    %c0_i32_1 = arith.constant 0 : i32
    %c0_i32_2 = arith.constant 0 : i32
    return %c0_i32, %c0_i32_0, %c0_i32_1 : i32, i32, i32
  }
  func.func @transform_3(%arg0: i32) -> (i32, i32, i32) {
    %c0_i32 = arith.constant 0 : i32
    %c0_i32_0 = arith.constant 0 : i32
    %c0_i32_1 = arith.constant 0 : i32
    %c0_i32_2 = arith.constant 0 : i32
    return %c0_i32, %c0_i32_0, %c0_i32_1 : i32, i32, i32
  }
  func.func @transform_4(%arg0: i32) -> (i32, i32) {
    %c0_i32 = arith.constant 0 : i32
    %c0_i32_0 = arith.constant 0 : i32
    %c0_i32_1 = arith.constant 0 : i32
    return %c0_i32, %c0_i32_0 : i32, i32
  }
  func.func @transform_5(%arg0: i32) -> (i32, i32) {
    %c0_i32 = arith.constant 0 : i32
    %c0_i32_0 = arith.constant 0 : i32
    %c0_i32_1 = arith.constant 0 : i32
    return %c0_i32, %c0_i32_0 : i32, i32
  }
  func.func @transform_6(%arg0: i32) -> (i32, i32) {
    %c0_i32 = arith.constant 0 : i32
    %c0_i32_0 = arith.constant 0 : i32
    %c0_i32_1 = arith.constant 0 : i32
    return %c0_i32, %c0_i32_0 : i32, i32
  }
  func.func @transform_7(%arg0: i32) -> (i32, i32) {
    %c0_i32 = arith.constant 0 : i32
    %c0_i32_0 = arith.constant 0 : i32
    %c0_i32_1 = arith.constant 0 : i32
    return %c0_i32, %c0_i32_0 : i32, i32
  }
  func.func @transform_8(%arg0: i32) -> (i32, i32) {
    %c0_i32 = arith.constant 0 : i32
    %c0_i32_0 = arith.constant 0 : i32
    %c0_i32_1 = arith.constant 0 : i32
    return %c0_i32, %c0_i32_0 : i32, i32
  }
  func.func @transform_9(%arg0: i32) -> (i32, i32, i32, i32) {
    %c0_i32 = arith.constant 0 : i32
    %c0_i32_0 = arith.constant 0 : i32
    %c0_i32_1 = arith.constant 0 : i32
    %c0_i32_2 = arith.constant 0 : i32
    return %arg0, %c0_i32, %c0_i32_0, %c0_i32_1 : i32, i32, i32, i32
  }
}

module attributes {stable_mosaic.version = 11 : i64} {
  func.func @kernel(%arg0: i32, %arg1: memref<1x12x32xbf16, #tpu.memory_space<vmem>>, %arg2: memref<5x32x32xbf16, #tpu.memory_space<vmem>>, %arg3: memref<5x32x32xbf16, #tpu.memory_space<vmem>>, %arg4: memref<5x32x32xbf16, #tpu.memory_space<vmem>>, %arg5: memref<1x32xf32, #tpu.memory_space<vmem>>, %arg6: memref<1x32xf32, #tpu.memory_space<vmem>>, %arg7: memref<1x32xf32, #tpu.memory_space<vmem>>, %arg8: memref<32x128xbf16, #tpu.memory_space<vmem>>, %arg9: memref<1x128xf32, #tpu.memory_space<vmem>>, %arg10: memref<1x2x16x64xbf16, #tpu.memory_space<vmem>>, %arg11: memref<16x32xbf16, #tpu.memory_space<vmem>>) attributes {dimension_semantics = [#tpu.dimension_semantics<parallel>], iteration_bounds = array<i64: 2>, scalar_prefetch = 0 : i64, scratch_operands = 1 : i64, tpu.core_type = #tpu.core_type<tc>, window_params = [{transform_indices = @transform_0, window_bounds = array<i64: 1, 12, 32>}, {pipeline_mode = #tpu.pipeline_mode<synchronous>, transform_indices = @transform_1, window_bounds = array<i64: 5, 32, 32>}, {pipeline_mode = #tpu.pipeline_mode<synchronous>, transform_indices = @transform_2, window_bounds = array<i64: 5, 32, 32>}, {pipeline_mode = #tpu.pipeline_mode<synchronous>, transform_indices = @transform_3, window_bounds = array<i64: 5, 32, 32>}, {pipeline_mode = #tpu.pipeline_mode<synchronous>, transform_indices = @transform_4, window_bounds = array<i64: 1, 32>}, {pipeline_mode = #tpu.pipeline_mode<synchronous>, transform_indices = @transform_5, window_bounds = array<i64: 1, 32>}, {pipeline_mode = #tpu.pipeline_mode<synchronous>, transform_indices = @transform_6, window_bounds = array<i64: 1, 32>}, {pipeline_mode = #tpu.pipeline_mode<synchronous>, transform_indices = @transform_7, window_bounds = array<i64: 32, 128>}, {pipeline_mode = #tpu.pipeline_mode<synchronous>, transform_indices = @transform_8, window_bounds = array<i64: 1, 128>}, {transform_indices = @transform_9, window_bounds = array<i64: 1, 2, 16, 64>}]} {
    %cst = arith.constant 0.000000e+00 : bf16
    %0 = vector.broadcast %cst : bf16 to vector<2x32xbf16>
    %c0 = arith.constant 0 : index
    %c0_0 = arith.constant 0 : index
    %1 = vector.load %arg11[%c0, %c0_0] : memref<16x32xbf16, #tpu.memory_space<vmem>>, vector<2x32xbf16>
    tpu.vector_store %arg11[%c0, %c0_0], %0 {strides = array<i32>} : memref<16x32xbf16, #tpu.memory_space<vmem>>, vector<2x32xbf16>,
    %cst_1 = arith.constant 0.000000e+00 : bf16
    %2 = vector.broadcast %cst_1 : bf16 to vector<2x32xbf16>
    %c14 = arith.constant 14 : index
    %c0_2 = arith.constant 0 : index
    %3 = vector.load %arg11[%c14, %c0_2] : memref<16x32xbf16, #tpu.memory_space<vmem>>, vector<2x32xbf16>
    tpu.vector_store %arg11[%c14, %c0_2], %2 {strides = array<i32>} : memref<16x32xbf16, #tpu.memory_space<vmem>>, vector<2x32xbf16>,
    %c0_3 = arith.constant 0 : index
    %c0_4 = arith.constant 0 : index
    %c0_5 = arith.constant 0 : index
    %4 = vector.load %arg1[%c0_3, %c0_4, %c0_5] : memref<1x12x32xbf16, #tpu.memory_space<vmem>>, vector<1x12x32xbf16>
    %5 = vector.shape_cast %4 : vector<1x12x32xbf16> to vector<12x32xbf16>
    %c2 = arith.constant 2 : index
    %c0_6 = arith.constant 0 : index
    %6 = vector.load %arg11[%c2, %c0_6] : memref<16x32xbf16, #tpu.memory_space<vmem>>, vector<12x32xbf16>
    tpu.vector_store %arg11[%c2, %c0_6], %5 {strides = array<i32>} : memref<16x32xbf16, #tpu.memory_space<vmem>>, vector<12x32xbf16>,
    %c0_7 = arith.constant 0 : index
    %c0_8 = arith.constant 0 : index
    %7 = vector.load %arg11[%c0_7, %c0_8] : memref<16x32xbf16, #tpu.memory_space<vmem>>, vector<12x32xbf16>
    %c0_9 = arith.constant 0 : index
    %c0_10 = arith.constant 0 : index
    %c0_11 = arith.constant 0 : index
    %8 = vector.load %arg2[%c0_9, %c0_10, %c0_11] : memref<5x32x32xbf16, #tpu.memory_space<vmem>>, vector<1x32x32xbf16>
    %9 = vector.shape_cast %8 : vector<1x32x32xbf16> to vector<32x32xbf16>
    %cst_12 = arith.constant dense<0.000000e+00> : vector<12x32xf32>
    %10 = tpu.matmul %7, %9, %cst_12 {dimension_numbers = #tpu.dot_dimension_numbers<[1], [0], [0], [1], [0, 0, 1, 1], [], []>} : vector<12x32xbf16>, vector<32x32xbf16>, vector<12x32xf32> -> vector<12x32xf32>
    %c1 = arith.constant 1 : index
    %c0_13 = arith.constant 0 : index
    %11 = vector.load %arg11[%c1, %c0_13] : memref<16x32xbf16, #tpu.memory_space<vmem>>, vector<12x32xbf16>
    %c1_14 = arith.constant 1 : index
    %c0_15 = arith.constant 0 : index
    %c0_16 = arith.constant 0 : index
    %12 = vector.load %arg2[%c1_14, %c0_15, %c0_16] : memref<5x32x32xbf16, #tpu.memory_space<vmem>>, vector<1x32x32xbf16>
    %13 = vector.shape_cast %12 : vector<1x32x32xbf16> to vector<32x32xbf16>
    %cst_17 = arith.constant dense<0.000000e+00> : vector<12x32xf32>
    %14 = tpu.matmul %11, %13, %cst_17 {dimension_numbers = #tpu.dot_dimension_numbers<[1], [0], [0], [1], [0, 0, 1, 1], [], []>} : vector<12x32xbf16>, vector<32x32xbf16>, vector<12x32xf32> -> vector<12x32xf32>
    %15 = arith.addf %10, %14 : vector<12x32xf32>
    %c2_18 = arith.constant 2 : index
    %c0_19 = arith.constant 0 : index
    %16 = vector.load %arg11[%c2_18, %c0_19] : memref<16x32xbf16, #tpu.memory_space<vmem>>, vector<12x32xbf16>
    %c2_20 = arith.constant 2 : index
    %c0_21 = arith.constant 0 : index
    %c0_22 = arith.constant 0 : index
    %17 = vector.load %arg2[%c2_20, %c0_21, %c0_22] : memref<5x32x32xbf16, #tpu.memory_space<vmem>>, vector<1x32x32xbf16>
    %18 = vector.shape_cast %17 : vector<1x32x32xbf16> to vector<32x32xbf16>
    %cst_23 = arith.constant dense<0.000000e+00> : vector<12x32xf32>
    %19 = tpu.matmul %16, %18, %cst_23 {dimension_numbers = #tpu.dot_dimension_numbers<[1], [0], [0], [1], [0, 0, 1, 1], [], []>} : vector<12x32xbf16>, vector<32x32xbf16>, vector<12x32xf32> -> vector<12x32xf32>
    %20 = arith.addf %15, %19 : vector<12x32xf32>
    %c3 = arith.constant 3 : index
    %c0_24 = arith.constant 0 : index
    %21 = vector.load %arg11[%c3, %c0_24] : memref<16x32xbf16, #tpu.memory_space<vmem>>, vector<12x32xbf16>
    %c3_25 = arith.constant 3 : index
    %c0_26 = arith.constant 0 : index
    %c0_27 = arith.constant 0 : index
    %22 = vector.load %arg2[%c3_25, %c0_26, %c0_27] : memref<5x32x32xbf16, #tpu.memory_space<vmem>>, vector<1x32x32xbf16>
    %23 = vector.shape_cast %22 : vector<1x32x32xbf16> to vector<32x32xbf16>
    %cst_28 = arith.constant dense<0.000000e+00> : vector<12x32xf32>
    %24 = tpu.matmul %21, %23, %cst_28 {dimension_numbers = #tpu.dot_dimension_numbers<[1], [0], [0], [1], [0, 0, 1, 1], [], []>} : vector<12x32xbf16>, vector<32x32xbf16>, vector<12x32xf32> -> vector<12x32xf32>
    %25 = arith.addf %20, %24 : vector<12x32xf32>
    %c4 = arith.constant 4 : index
    %c0_29 = arith.constant 0 : index
    %26 = vector.load %arg11[%c4, %c0_29] : memref<16x32xbf16, #tpu.memory_space<vmem>>, vector<12x32xbf16>
    %c4_30 = arith.constant 4 : index
    %c0_31 = arith.constant 0 : index
    %c0_32 = arith.constant 0 : index
    %27 = vector.load %arg2[%c4_30, %c0_31, %c0_32] : memref<5x32x32xbf16, #tpu.memory_space<vmem>>, vector<1x32x32xbf16>
    %28 = vector.shape_cast %27 : vector<1x32x32xbf16> to vector<32x32xbf16>
    %cst_33 = arith.constant dense<0.000000e+00> : vector<12x32xf32>
    %29 = tpu.matmul %26, %28, %cst_33 {dimension_numbers = #tpu.dot_dimension_numbers<[1], [0], [0], [1], [0, 0, 1, 1], [], []>} : vector<12x32xbf16>, vector<32x32xbf16>, vector<12x32xf32> -> vector<12x32xf32>
    %30 = arith.addf %25, %29 : vector<12x32xf32>
    %c0_34 = arith.constant 0 : index
    %c0_35 = arith.constant 0 : index
    %31 = vector.load %arg5[%c0_34, %c0_35] : memref<1x32xf32, #tpu.memory_space<vmem>>, vector<1x32xf32>
    %32 = vector.broadcast %31 : vector<1x32xf32> to vector<12x32xf32>
    %33 = arith.addf %30, %32 : vector<12x32xf32>
    %cst_36 = arith.constant 0.000000e+00 : f32
    %34 = vector.broadcast %cst_36 : f32 to vector<12x32xf32>
    %35 = arith.maximumf %33, %34 : vector<12x32xf32>
    %36 = arith.truncf %35 : vector<12x32xf32> to vector<12x32xbf16>
    %c2_37 = arith.constant 2 : index
    %c0_38 = arith.constant 0 : index
    %37 = vector.load %arg11[%c2_37, %c0_38] : memref<16x32xbf16, #tpu.memory_space<vmem>>, vector<12x32xbf16>
    tpu.vector_store %arg11[%c2_37, %c0_38], %36 {strides = array<i32>} : memref<16x32xbf16, #tpu.memory_space<vmem>>, vector<12x32xbf16>,
    %c0_39 = arith.constant 0 : index
    %c0_40 = arith.constant 0 : index
    %38 = vector.load %arg11[%c0_39, %c0_40] : memref<16x32xbf16, #tpu.memory_space<vmem>>, vector<12x32xbf16>
    %c0_41 = arith.constant 0 : index
    %c0_42 = arith.constant 0 : index
    %c0_43 = arith.constant 0 : index
    %39 = vector.load %arg3[%c0_41, %c0_42, %c0_43] : memref<5x32x32xbf16, #tpu.memory_space<vmem>>, vector<1x32x32xbf16>
    %40 = vector.shape_cast %39 : vector<1x32x32xbf16> to vector<32x32xbf16>
    %cst_44 = arith.constant dense<0.000000e+00> : vector<12x32xf32>
    %41 = tpu.matmul %38, %40, %cst_44 {dimension_numbers = #tpu.dot_dimension_numbers<[1], [0], [0], [1], [0, 0, 1, 1], [], []>} : vector<12x32xbf16>, vector<32x32xbf16>, vector<12x32xf32> -> vector<12x32xf32>
    %c1_45 = arith.constant 1 : index
    %c0_46 = arith.constant 0 : index
    %42 = vector.load %arg11[%c1_45, %c0_46] : memref<16x32xbf16, #tpu.memory_space<vmem>>, vector<12x32xbf16>
    %c1_47 = arith.constant 1 : index
    %c0_48 = arith.constant 0 : index
    %c0_49 = arith.constant 0 : index
    %43 = vector.load %arg3[%c1_47, %c0_48, %c0_49] : memref<5x32x32xbf16, #tpu.memory_space<vmem>>, vector<1x32x32xbf16>
    %44 = vector.shape_cast %43 : vector<1x32x32xbf16> to vector<32x32xbf16>
    %cst_50 = arith.constant dense<0.000000e+00> : vector<12x32xf32>
    %45 = tpu.matmul %42, %44, %cst_50 {dimension_numbers = #tpu.dot_dimension_numbers<[1], [0], [0], [1], [0, 0, 1, 1], [], []>} : vector<12x32xbf16>, vector<32x32xbf16>, vector<12x32xf32> -> vector<12x32xf32>
    %46 = arith.addf %41, %45 : vector<12x32xf32>
    %c2_51 = arith.constant 2 : index
    %c0_52 = arith.constant 0 : index
    %47 = vector.load %arg11[%c2_51, %c0_52] : memref<16x32xbf16, #tpu.memory_space<vmem>>, vector<12x32xbf16>
    %c2_53 = arith.constant 2 : index
    %c0_54 = arith.constant 0 : index
    %c0_55 = arith.constant 0 : index
    %48 = vector.load %arg3[%c2_53, %c0_54, %c0_55] : memref<5x32x32xbf16, #tpu.memory_space<vmem>>, vector<1x32x32xbf16>
    %49 = vector.shape_cast %48 : vector<1x32x32xbf16> to vector<32x32xbf16>
    %cst_56 = arith.constant dense<0.000000e+00> : vector<12x32xf32>
    %50 = tpu.matmul %47, %49, %cst_56 {dimension_numbers = #tpu.dot_dimension_numbers<[1], [0], [0], [1], [0, 0, 1, 1], [], []>} : vector<12x32xbf16>, vector<32x32xbf16>, vector<12x32xf32> -> vector<12x32xf32>
    %51 = arith.addf %46, %50 : vector<12x32xf32>
    %c3_57 = arith.constant 3 : index
    %c0_58 = arith.constant 0 : index
    %52 = vector.load %arg11[%c3_57, %c0_58] : memref<16x32xbf16, #tpu.memory_space<vmem>>, vector<12x32xbf16>
    %c3_59 = arith.constant 3 : index
    %c0_60 = arith.constant 0 : index
    %c0_61 = arith.constant 0 : index
    %53 = vector.load %arg3[%c3_59, %c0_60, %c0_61] : memref<5x32x32xbf16, #tpu.memory_space<vmem>>, vector<1x32x32xbf16>
    %54 = vector.shape_cast %53 : vector<1x32x32xbf16> to vector<32x32xbf16>
    %cst_62 = arith.constant dense<0.000000e+00> : vector<12x32xf32>
    %55 = tpu.matmul %52, %54, %cst_62 {dimension_numbers = #tpu.dot_dimension_numbers<[1], [0], [0], [1], [0, 0, 1, 1], [], []>} : vector<12x32xbf16>, vector<32x32xbf16>, vector<12x32xf32> -> vector<12x32xf32>
    %56 = arith.addf %51, %55 : vector<12x32xf32>
    %c4_63 = arith.constant 4 : index
    %c0_64 = arith.constant 0 : index
    %57 = vector.load %arg11[%c4_63, %c0_64] : memref<16x32xbf16, #tpu.memory_space<vmem>>, vector<12x32xbf16>
    %c4_65 = arith.constant 4 : index
    %c0_66 = arith.constant 0 : index
    %c0_67 = arith.constant 0 : index
    %58 = vector.load %arg3[%c4_65, %c0_66, %c0_67] : memref<5x32x32xbf16, #tpu.memory_space<vmem>>, vector<1x32x32xbf16>
    %59 = vector.shape_cast %58 : vector<1x32x32xbf16> to vector<32x32xbf16>
    %cst_68 = arith.constant dense<0.000000e+00> : vector<12x32xf32>
    %60 = tpu.matmul %57, %59, %cst_68 {dimension_numbers = #tpu.dot_dimension_numbers<[1], [0], [0], [1], [0, 0, 1, 1], [], []>} : vector<12x32xbf16>, vector<32x32xbf16>, vector<12x32xf32> -> vector<12x32xf32>
    %61 = arith.addf %56, %60 : vector<12x32xf32>
    %c0_69 = arith.constant 0 : index
    %c0_70 = arith.constant 0 : index
    %62 = vector.load %arg6[%c0_69, %c0_70] : memref<1x32xf32, #tpu.memory_space<vmem>>, vector<1x32xf32>
    %63 = vector.broadcast %62 : vector<1x32xf32> to vector<12x32xf32>
    %64 = arith.addf %61, %63 : vector<12x32xf32>
    %cst_71 = arith.constant 0.000000e+00 : f32
    %65 = vector.broadcast %cst_71 : f32 to vector<12x32xf32>
    %66 = arith.maximumf %64, %65 : vector<12x32xf32>
    %67 = arith.truncf %66 : vector<12x32xf32> to vector<12x32xbf16>
    %c2_72 = arith.constant 2 : index
    %c0_73 = arith.constant 0 : index
    %68 = vector.load %arg11[%c2_72, %c0_73] : memref<16x32xbf16, #tpu.memory_space<vmem>>, vector<12x32xbf16>
    tpu.vector_store %arg11[%c2_72, %c0_73], %67 {strides = array<i32>} : memref<16x32xbf16, #tpu.memory_space<vmem>>, vector<12x32xbf16>,
    %c0_74 = arith.constant 0 : index
    %c0_75 = arith.constant 0 : index
    %69 = vector.load %arg11[%c0_74, %c0_75] : memref<16x32xbf16, #tpu.memory_space<vmem>>, vector<12x32xbf16>
    %c0_76 = arith.constant 0 : index
    %c0_77 = arith.constant 0 : index
    %c0_78 = arith.constant 0 : index
    %70 = vector.load %arg4[%c0_76, %c0_77, %c0_78] : memref<5x32x32xbf16, #tpu.memory_space<vmem>>, vector<1x32x32xbf16>
    %71 = vector.shape_cast %70 : vector<1x32x32xbf16> to vector<32x32xbf16>
    %cst_79 = arith.constant dense<0.000000e+00> : vector<12x32xf32>
    %72 = tpu.matmul %69, %71, %cst_79 {dimension_numbers = #tpu.dot_dimension_numbers<[1], [0], [0], [1], [0, 0, 1, 1], [], []>} : vector<12x32xbf16>, vector<32x32xbf16>, vector<12x32xf32> -> vector<12x32xf32>
    %c1_80 = arith.constant 1 : index
    %c0_81 = arith.constant 0 : index
    %73 = vector.load %arg11[%c1_80, %c0_81] : memref<16x32xbf16, #tpu.memory_space<vmem>>, vector<12x32xbf16>
    %c1_82 = arith.constant 1 : index
    %c0_83 = arith.constant 0 : index
    %c0_84 = arith.constant 0 : index
    %74 = vector.load %arg4[%c1_82, %c0_83, %c0_84] : memref<5x32x32xbf16, #tpu.memory_space<vmem>>, vector<1x32x32xbf16>
    %75 = vector.shape_cast %74 : vector<1x32x32xbf16> to vector<32x32xbf16>
    %cst_85 = arith.constant dense<0.000000e+00> : vector<12x32xf32>
    %76 = tpu.matmul %73, %75, %cst_85 {dimension_numbers = #tpu.dot_dimension_numbers<[1], [0], [0], [1], [0, 0, 1, 1], [], []>} : vector<12x32xbf16>, vector<32x32xbf16>, vector<12x32xf32> -> vector<12x32xf32>
    %77 = arith.addf %72, %76 : vector<12x32xf32>
    %c2_86 = arith.constant 2 : index
    %c0_87 = arith.constant 0 : index
    %78 = vector.load %arg11[%c2_86, %c0_87] : memref<16x32xbf16, #tpu.memory_space<vmem>>, vector<12x32xbf16>
    %c2_88 = arith.constant 2 : index
    %c0_89 = arith.constant 0 : index
    %c0_90 = arith.constant 0 : index
    %79 = vector.load %arg4[%c2_88, %c0_89, %c0_90] : memref<5x32x32xbf16, #tpu.memory_space<vmem>>, vector<1x32x32xbf16>
    %80 = vector.shape_cast %79 : vector<1x32x32xbf16> to vector<32x32xbf16>
    %cst_91 = arith.constant dense<0.000000e+00> : vector<12x32xf32>
    %81 = tpu.matmul %78, %80, %cst_91 {dimension_numbers = #tpu.dot_dimension_numbers<[1], [0], [0], [1], [0, 0, 1, 1], [], []>} : vector<12x32xbf16>, vector<32x32xbf16>, vector<12x32xf32> -> vector<12x32xf32>
    %82 = arith.addf %77, %81 : vector<12x32xf32>
    %c3_92 = arith.constant 3 : index
    %c0_93 = arith.constant 0 : index
    %83 = vector.load %arg11[%c3_92, %c0_93] : memref<16x32xbf16, #tpu.memory_space<vmem>>, vector<12x32xbf16>
    %c3_94 = arith.constant 3 : index
    %c0_95 = arith.constant 0 : index
    %c0_96 = arith.constant 0 : index
    %84 = vector.load %arg4[%c3_94, %c0_95, %c0_96] : memref<5x32x32xbf16, #tpu.memory_space<vmem>>, vector<1x32x32xbf16>
    %85 = vector.shape_cast %84 : vector<1x32x32xbf16> to vector<32x32xbf16>
    %cst_97 = arith.constant dense<0.000000e+00> : vector<12x32xf32>
    %86 = tpu.matmul %83, %85, %cst_97 {dimension_numbers = #tpu.dot_dimension_numbers<[1], [0], [0], [1], [0, 0, 1, 1], [], []>} : vector<12x32xbf16>, vector<32x32xbf16>, vector<12x32xf32> -> vector<12x32xf32>
    %87 = arith.addf %82, %86 : vector<12x32xf32>
    %c4_98 = arith.constant 4 : index
    %c0_99 = arith.constant 0 : index
    %88 = vector.load %arg11[%c4_98, %c0_99] : memref<16x32xbf16, #tpu.memory_space<vmem>>, vector<12x32xbf16>
    %c4_100 = arith.constant 4 : index
    %c0_101 = arith.constant 0 : index
    %c0_102 = arith.constant 0 : index
    %89 = vector.load %arg4[%c4_100, %c0_101, %c0_102] : memref<5x32x32xbf16, #tpu.memory_space<vmem>>, vector<1x32x32xbf16>
    %90 = vector.shape_cast %89 : vector<1x32x32xbf16> to vector<32x32xbf16>
    %cst_103 = arith.constant dense<0.000000e+00> : vector<12x32xf32>
    %91 = tpu.matmul %88, %90, %cst_103 {dimension_numbers = #tpu.dot_dimension_numbers<[1], [0], [0], [1], [0, 0, 1, 1], [], []>} : vector<12x32xbf16>, vector<32x32xbf16>, vector<12x32xf32> -> vector<12x32xf32>
    %92 = arith.addf %87, %91 : vector<12x32xf32>
    %c0_104 = arith.constant 0 : index
    %c0_105 = arith.constant 0 : index
    %93 = vector.load %arg7[%c0_104, %c0_105] : memref<1x32xf32, #tpu.memory_space<vmem>>, vector<1x32xf32>
    %94 = vector.broadcast %93 : vector<1x32xf32> to vector<12x32xf32>
    %95 = arith.addf %92, %94 : vector<12x32xf32>
    %cst_106 = arith.constant 0.000000e+00 : f32
    %96 = vector.broadcast %cst_106 : f32 to vector<12x32xf32>
    %97 = arith.maximumf %95, %96 : vector<12x32xf32>
    %98 = arith.truncf %97 : vector<12x32xf32> to vector<12x32xbf16>
    %c2_107 = arith.constant 2 : index
    %c0_108 = arith.constant 0 : index
    %99 = vector.load %arg11[%c2_107, %c0_108] : memref<16x32xbf16, #tpu.memory_space<vmem>>, vector<12x32xbf16>
    tpu.vector_store %arg11[%c2_107, %c0_108], %98 {strides = array<i32>} : memref<16x32xbf16, #tpu.memory_space<vmem>>, vector<12x32xbf16>,
    %c2_109 = arith.constant 2 : index
    %c0_110 = arith.constant 0 : index
    %100 = vector.load %arg11[%c2_109, %c0_110] : memref<16x32xbf16, #tpu.memory_space<vmem>>, vector<12x32xbf16>
    %c0_111 = arith.constant 0 : index
    %c0_112 = arith.constant 0 : index
    %101 = vector.load %arg8[%c0_111, %c0_112] : memref<32x128xbf16, #tpu.memory_space<vmem>>, vector<32x128xbf16>
    %cst_113 = arith.constant dense<0.000000e+00> : vector<12x128xf32>
    %102 = tpu.matmul %100, %101, %cst_113 {dimension_numbers = #tpu.dot_dimension_numbers<[1], [0], [0], [1], [0, 0, 1, 1], [], []>} : vector<12x32xbf16>, vector<32x128xbf16>, vector<12x128xf32> -> vector<12x128xf32>
    %c0_114 = arith.constant 0 : index
    %c0_115 = arith.constant 0 : index
    %103 = vector.load %arg9[%c0_114, %c0_115] : memref<1x128xf32, #tpu.memory_space<vmem>>, vector<1x128xf32>
    %104 = vector.broadcast %103 : vector<1x128xf32> to vector<12x128xf32>
    %105 = arith.addf %102, %104 : vector<12x128xf32>
    %106 = arith.truncf %105 : vector<12x128xf32> to vector<12x128xbf16>
    %107 = vector.extract_strided_slice %106 {offsets = [0, 0], sizes = [12, 64], strides = [1, 1]} : vector<12x128xbf16> to vector<12x64xbf16>
    %c0_116 = arith.constant 0 : index
    %c0_117 = arith.constant 0 : index
    %c0_118 = arith.constant 0 : index
    %c0_119 = arith.constant 0 : index
    %108 = vector.load %arg10[%c0_116, %c0_117, %c0_118, %c0_119] : memref<1x2x16x64xbf16, #tpu.memory_space<vmem>>, vector<1x1x12x64xbf16>
    %109 = vector.shape_cast %108 : vector<1x1x12x64xbf16> to vector<12x64xbf16>
    %110 = vector.shape_cast %107 : vector<12x64xbf16> to vector<1x1x12x64xbf16>
    tpu.vector_store %arg10[%c0_116, %c0_117, %c0_118, %c0_119], %110 {strides = array<i32>} : memref<1x2x16x64xbf16, #tpu.memory_space<vmem>>, vector<1x1x12x64xbf16>,
    %111 = vector.extract_strided_slice %106 {offsets = [0, 64], sizes = [12, 64], strides = [1, 1]} : vector<12x128xbf16> to vector<12x64xbf16>
    %c0_120 = arith.constant 0 : index
    %c1_121 = arith.constant 1 : index
    %c0_122 = arith.constant 0 : index
    %c0_123 = arith.constant 0 : index
    %112 = vector.load %arg10[%c0_120, %c1_121, %c0_122, %c0_123] : memref<1x2x16x64xbf16, #tpu.memory_space<vmem>>, vector<1x1x12x64xbf16>
    %113 = vector.shape_cast %112 : vector<1x1x12x64xbf16> to vector<12x64xbf16>
    %114 = vector.shape_cast %111 : vector<12x64xbf16> to vector<1x1x12x64xbf16>
    tpu.vector_store %arg10[%c0_120, %c1_121, %c0_122, %c0_123], %114 {strides = array<i32>} : memref<1x2x16x64xbf16, #tpu.memory_space<vmem>>, vector<1x1x12x64xbf16>,
    %cst_124 = arith.constant 0.000000e+00 : bf16
    %115 = vector.broadcast %cst_124 : bf16 to vector<2x4x64xbf16>
    %c0_125 = arith.constant 0 : index
    %c0_126 = arith.constant 0 : index
    %c12 = arith.constant 12 : index
    %c0_127 = arith.constant 0 : index
    %116 = vector.load %arg10[%c0_125, %c0_126, %c12, %c0_127] : memref<1x2x16x64xbf16, #tpu.memory_space<vmem>>, vector<1x2x4x64xbf16>
    %117 = vector.shape_cast %116 : vector<1x2x4x64xbf16> to vector<2x4x64xbf16>
    %118 = vector.shape_cast %115 : vector<2x4x64xbf16> to vector<1x2x4x64xbf16>
    tpu.vector_store %arg10[%c0_125, %c0_126, %c12, %c0_127], %118 {strides = array<i32>} : memref<1x2x16x64xbf16, #tpu.memory_space<vmem>>, vector<1x2x4x64xbf16>,
    return
  }
  func.func @transform_0(%arg0: i32) -> (i32, i32, i32) {
    %c0_i32 = arith.constant 0 : i32
    %c0_i32_0 = arith.constant 0 : i32
    %c0_i32_1 = arith.constant 0 : i32
    return %arg0, %c0_i32, %c0_i32_0 : i32, i32, i32
  }
  func.func @transform_1(%arg0: i32) -> (i32, i32, i32) {
    %c0_i32 = arith.constant 0 : i32
    %c0_i32_0 = arith.constant 0 : i32
    %c0_i32_1 = arith.constant 0 : i32
    %c0_i32_2 = arith.constant 0 : i32
    return %c0_i32, %c0_i32_0, %c0_i32_1 : i32, i32, i32
  }
  func.func @transform_2(%arg0: i32) -> (i32, i32, i32) {
    %c0_i32 = arith.constant 0 : i32
    %c0_i32_0 = arith.constant 0 : i32
    %c0_i32_1 = arith.constant 0 : i32
    %c0_i32_2 = arith.constant 0 : i32
    return %c0_i32, %c0_i32_0, %c0_i32_1 : i32, i32, i32
  }
  func.func @transform_3(%arg0: i32) -> (i32, i32, i32) {
    %c0_i32 = arith.constant 0 : i32
    %c0_i32_0 = arith.constant 0 : i32
    %c0_i32_1 = arith.constant 0 : i32
    %c0_i32_2 = arith.constant 0 : i32
    return %c0_i32, %c0_i32_0, %c0_i32_1 : i32, i32, i32
  }
  func.func @transform_4(%arg0: i32) -> (i32, i32) {
    %c0_i32 = arith.constant 0 : i32
    %c0_i32_0 = arith.constant 0 : i32
    %c0_i32_1 = arith.constant 0 : i32
    return %c0_i32, %c0_i32_0 : i32, i32
  }
  func.func @transform_5(%arg0: i32) -> (i32, i32) {
    %c0_i32 = arith.constant 0 : i32
    %c0_i32_0 = arith.constant 0 : i32
    %c0_i32_1 = arith.constant 0 : i32
    return %c0_i32, %c0_i32_0 : i32, i32
  }
  func.func @transform_6(%arg0: i32) -> (i32, i32) {
    %c0_i32 = arith.constant 0 : i32
    %c0_i32_0 = arith.constant 0 : i32
    %c0_i32_1 = arith.constant 0 : i32
    return %c0_i32, %c0_i32_0 : i32, i32
  }
  func.func @transform_7(%arg0: i32) -> (i32, i32) {
    %c0_i32 = arith.constant 0 : i32
    %c0_i32_0 = arith.constant 0 : i32
    %c0_i32_1 = arith.constant 0 : i32
    return %c0_i32, %c0_i32_0 : i32, i32
  }
  func.func @transform_8(%arg0: i32) -> (i32, i32) {
    %c0_i32 = arith.constant 0 : i32
    %c0_i32_0 = arith.constant 0 : i32
    %c0_i32_1 = arith.constant 0 : i32
    return %c0_i32, %c0_i32_0 : i32, i32
  }
  func.func @transform_9(%arg0: i32) -> (i32, i32, i32, i32) {
    %c0_i32 = arith.constant 0 : i32
    %c0_i32_0 = arith.constant 0 : i32
    %c0_i32_1 = arith.constant 0 : i32
    %c0_i32_2 = arith.constant 0 : i32
    return %arg0, %c0_i32, %c0_i32_0, %c0_i32_1 : i32, i32, i32, i32
  }
}

</mosaic_0001>

<bundles_post_ra>
// kernel: tpu_custom_call.1
= control target key start
LH: loop header
LB: loop body
LE: loop exit
PB: predicated region body
PF: predicated region fallthrough
CT: control target
= control target key end

     0   :  { %14 = vsyncpa [#allocation4], 0  ;;  %s2625_s0 = inlined_call_operand.vmem [shape: bf16[2,12,32], index: 0, kind: input, shape index: {}]   ;;  %s2626_s1 = inlined_call_operand.hbm [shape: bf16[5,32,32], index: 1, kind: input, shape index: {}]   ;;  %s2627_s2 = inlined_call_operand.hbm [shape: bf16[5,32,32], index: 2, kind: input, shape index: {}]   ;;  %s2628_s3 = inlined_call_operand.hbm [shape: bf16[5,32,32], index: 3, kind: input, shape index: {}]   ;;  %s2629_s4 = inlined_call_operand.vmem [shape: f32[1,32], index: 4, kind: input, shape index: {}]   ;;  %s2630_s5 = inlined_call_operand.vmem [shape: f32[1,32], index: 5, kind: input, shape index: {}]   ;;  %s2631_s6 = inlined_call_operand.vmem [shape: f32[1,32], index: 6, kind: input, shape index: {}]   ;;  %s2632_s7 = inlined_call_operand.vmem [shape: bf16[32,128], index: 7, kind: input, shape index: {}]   ;;  %s2633_s8 = inlined_call_operand.vmem [shape: f32[1,128], index: 8, kind: input, shape index: {}]   ;;  %s2634_s9 = inlined_call_operand.hbm [shape: bf16[2,2,16,64], index: 9, kind: output, shape index: {}]  }
   0x1   :  { %15 = vsyncpa [#allocation7], 0 }
   0x2   :  { %16 = vsyncpa [#allocation5], 0 }
   0x3   :  { %18 = vsyncpa [#allocation5 + $0x1], 0  ;;  %s2344_s30 = smov 0   ;;  %s2346_s10 = smov 0  }
   0x4   :  { %s2348_s11 = smov 0   ;;  %s2350_s12 = smov 0  }
   0x5 LB: > { %s2365_s13 = sadd.s32 4294967295, %s2281_s12   ;;  %s1729_s14 = sadd.s32 4294967294, %s2281_s12   ;;  %s2281_s12 = sphi %s2350_s12, %s2652_s12   ;;  %s2277_s11 = sphi %s2348_s11, %s2651_s11   ;;  %s2273_s10 = sphi %s2346_s10, %s2650_s10   ;;  %s2269_s30 = sphi %s2344_s30, %s2649_s30  }
   0x6   : > { %s2369_s15 = sadd.s32 1, %s2281_s12   ;;  %s225_s16 = sadd.s32 1, %s2277_s11 }
   0x7   : > { %s222_s17 = ssub.s32 %s2281_s12, %s2369_s15  ;;  %p235_p0 = scmp.ne.s32.totalorder %s2277_s11, %s2273_s10 }
   0x8   : > { %p223_p1 = scmp.eq.s32.totalorder %s222_s17, 0  ;;  %p236_p2 = scmp.eq.s32.totalorder %s2365_s13, 1 }
   0x9   : > { %p241_p3 = scmp.ne.s32.totalorder %s2273_s10, %s2269_s30  ;;  %p242_p4 = scmp.eq.s32.totalorder %s1729_s14, 1 }
   0xa   : > { %s2380_s18 = scalar_select %p223_p1, %s2277_s11, %s225_s16  }
   0xb   : > { %p2382_p5 = por %p236_p2, %p235_p0  ;;  %p2386_p6 = por %p242_p4, %p241_p3 }
   0xc   : > { %p1730_p7 = scmp.ge.s32.totalorder %s2281_s12, 1  ;;  %p249_p8 = scmp.lt.s32.totalorder %s2281_s12, 3 }
   0xd   : > { %s2637_s19 = scalar_select %p2382_p5, 1, 0 }
   0xe   : > { %s2638_s20 = scalar_select %p2386_p6, 1, 0 }
   0xf   : > { %p2635_p9 = scmp.eq.s32.totalorder %s2365_s13, 0  ;;  %p2393_p10 = pnand %p1730_p7, %p249_p8 }
  0x10   : > { %s2283_s22 = smov [#allocation6]   ;;  %s2284_s25 = smov [#allocation3]  }
  0x11   : > { %p2025_p11 = pneg %p2393_p10  ;;  %s274_s23 = sshll.u32 %s2283_s22, 4  ;;  %s275_s23 = int_to_ptr.vmem [resolvable:$true] %s274_s23 }
  0x12   : > { %s261_s26 = sshll.u32 %s2284_s25, 4  ;;  %s2285_s27 = smov [#allocation8]   ;;  %s262_s26 = int_to_ptr.vmem [resolvable:$true] %s261_s26 }
  0x13   : > { %p2401_p12 = pnand %p2635_p9, %p2025_p11  ;;  %s287_s28 = sshll.u32 %s2285_s27, 4  ;;  %s288_s28 = int_to_ptr.vmem [resolvable:$true] %s287_s28 }
  0x14   : > { %s2146_s29 = scalar_lea.vmem %s275_s23, 1280  ;;  %p2154_p3 = scmp.lt.s32.totalorder %s275_s23, %s275_s23 }
  0x15   : > { %p2137_p13 = pneg %p2401_p12  ;;  %p2147_p0 = scmp.ne.s32.totalorder %s275_s23, %s2146_s29 }
  0x16   : > { %p2155_p4 = scmp.lt.s32.totalorder %s2146_s29, %s2146_s29 }
  0x17   : > { %p2149_p1 = pnand %p2147_p0, %p2137_p13 }
  0x18   : > { %p2156_p7 = por %p2155_p4, %p2154_p3 }
  0x19   : > { %p2150_p2 = pneg %p2149_p1 }
  0x1b   : > { %p2157_p8 = pnand %p2156_p7, %p2150_p2 }
  0x1d   : > { %2160 = shalt.err (!%p2157_p8)
}
  0x1e   : > { %s2286_s14 = smov 64   ;;  %s2287_s16 = smov 4  }
  0x1f   : > { %2031 = dma.hbm_to_vmem [thread:$0]  (!%p2401_p12), %s2627_s2, 1280, %s275_s23, [#allocation7], %s2286_s14, %s2286_s14, %s2287_s16  }
  0x20   : > { %s2172_s25 = scalar_lea.vmem %s262_s26, 1280  ;;  %p2180_p9 = scmp.lt.s32.totalorder %s262_s26, %s262_s26 }
  0x21   : > { %p2173_p11 = scmp.ne.s32.totalorder %s262_s26, %s2172_s25  ;;  %p2181_p6 = scmp.lt.s32.totalorder %s2172_s25, %s2172_s25 }
  0x23   : > { %p2175_p0 = pnand %p2173_p11, %p2137_p13  ;;  %p2182_p3 = por %p2181_p6, %p2180_p9 }
  0x25   : > { %p2176_p1 = pneg %p2175_p0 }
  0x27   : > { %p2183_p2 = pnand %p2182_p3, %p2176_p1 }
  0x29   : > { %2186 = shalt.err (!%p2183_p2)
}
  0x2a   : > { %2028 = dma.hbm_to_vmem [thread:$0]  (!%p2401_p12), %s2626_s1, 1280, %s262_s26, [#allocation4], %s2286_s14, %s2286_s14, %s2287_s16  }
  0x2b   : > { %s2198_s23 = scalar_lea.vmem %s288_s28, 1280  ;;  %p2206_p11 = scmp.lt.s32.totalorder %s288_s28, %s288_s28 }
  0x2c   : > { %p2199_p4 = scmp.ne.s32.totalorder %s288_s28, %s2198_s23  ;;  %p2207_p0 = scmp.lt.s32.totalorder %s2198_s23, %s2198_s23 }
  0x2e   : > { %p2201_p7 = pnand %p2199_p4, %p2137_p13  ;;  %p2208_p5 = por %p2207_p0, %p2206_p11 }
  0x30   : > { %p2202_p8 = pneg %p2201_p7 }
  0x32   : > { %p2209_p6 = pnand %p2208_p5, %p2202_p8 }
  0x34   : > { %2212 = shalt.err (!%p2209_p6)
}
  0x35   : > { %2034 = dma.hbm_to_vmem [thread:$0]  (!%p2401_p12), %s2628_s3, 1280, %s288_s28, [#allocation7], %s2286_s14, %s2286_s14, %s2287_s16  }
  0x36   : > { %326 = sbr.rel (%p2393_p10) target bundleno = 1137 (0x471), region = 56  ;;  %p2641_p9 = scmp.eq.s32.totalorder (!%p2393_p10), %s2365_s13, 0 }
  0x3b   : > { %2256 = dma.done.wait (%p2641_p9), [#allocation4], 1280   ;;  %p2642_p13 = pmov %p2641_p9 }
  0x3c   : > { %p2643_p1 = pmov %p2641_p9 }
  0x3d   : > { %2258 = vsyncadd (%p2642_p13), [#allocation4], 4294966016 }
  0x3e   : > { %2260 = dma.done.wait (%p2643_p1), [#allocation7], 2560   ;;  %p2644_p5 = pmov %p2643_p1 }
  0x3f   : > { %p370_p3 = scmp.lt.s32.totalorder %s2365_s13, 1  ;;  %vm376_vm0 = vcmask 253952   ;;  %v2288_v0 = vmov 0.0   ;;  %vm2289_vm1 = vmmov 0   ;;  %v2290_v1 = vmov 0   ;;  %v2088_v2 = vld [vmem:[#allocation3 + $0x18] sm:$0xff]  }
  0x40   : > { %2262 = vsyncadd (%p2644_p5), [#allocation7], 4294964736  ;;  %1883 = vmatprep.subr.bf16.mxu0 %v2288_v0  ;;  %1891 = vmatprep.subr.bf16.mxu1 %v2288_v0  ;;  %377 = vst.msk [vmem:[#allocation2] sm:$0x1] %vm376_vm0, %v2290_v1  ;;  %vm378_vm2 = vcmask 257027   ;;  %v2089_v3 = vld [vmem:[#allocation3 + $0x8] sm:$0xff]  }
  0x41   : > { %1887 = vmatprep.mubr.msk.bf16.mxu0 %vm2289_vm1, %v2288_v0  ;;  %1895 = vmatprep.mubr.msk.bf16.mxu1 %vm2289_vm1, %v2288_v0  ;;  %s371_s21 = scalar_select %p370_p3, %s2365_s13, 1  ;;  %379 = vst.msk [vmem:[#allocation2 + $0x4] sm:$0x8] %vm378_vm2, %v2290_v1  ;;  %vm384_vm3 = vcmask 1040384   ;;  %v2090_v4 = vld [vmem:[#allocation3 + $0x10] sm:$0xff]   ;;  %vm385_vm4 = vcmask 1044484  }
  0x42   : > { %1884 = vmatpush3.bf16.msra.mxu0 %v2088_v2  ;;  %1892 = vmatpush3.bf16.msra.mxu1 %v2089_v3  ;;  %v2091_v5 = vld [vmem:[#allocation3] sm:$0xff]   ;;  %vm393_vm5 = vcmask 257025   ;;  %vm2456_vm6 = vmor %vm384_vm3, %vm385_vm4  ;;  %vm395_vm7 = vcmask 256000   ;;  %vm433_vm8 = vcmask 261120   ;;  %v2095_v15 = vld [vmem:[#allocation3 + $0x38] sm:$0xff]   ;;  %s367_s28 = sand.u32 1, %s2273_s10  }
  0x43   : > { %s1825_s24 = sshll.u32 %s371_s21, 3  ;;  %1885 = vmatprep.subr.bf16.mxu0 %v2288_v0  ;;  %1893 = vmatprep.subr.bf16.mxu1 %v2288_v0  ;;  %v2097_v25 = vld [vmem:[#allocation3 + $0x30] sm:$0xff]   ;;  %v2094_v29 = vld [vmem:[#allocation3 + $0x28] sm:$0xff]   ;;  %v2096_v32 = vld [vmem:[#allocation3 + $0x20] sm:$0xff]   ;;  %vm1619_vm9 = vcmask 519170   ;;  %vm1606_vm10 = vcmask 519168  }
  0x44   : > { %s374_s14 = scalar_lea.vmem %s2625_s0, %s1825_s24  ;;  %v2099_v36 = vld [vmem:[#allocation3 + $0x48] sm:$0xff]   ;;  %v2100_v39 = vld [vmem:[#allocation3 + $0x40] sm:$0xff]   ;;  %v2102_v41 = vld [vmem:[#allocation6 + $0x8] sm:$0xff]   ;;  %s2291_s29 = smov 64   ;;  %vm1608_vm11 = vcmask 517120  }
  0x45   : > { %v380_v6 = vld [vmem:[%s374_s14] sm:$0xf]  ;;  %v381_v7 = vld [vmem:[%s374_s14 + $0x4] sm:$0x3]  ;;  %v2104_v42 = vld [vmem:[#allocation6 + $0x18] sm:$0xff]   ;;  %s1739_s14 = sshll.u32 %s367_s28, 4 }
  0x46   : > { %v387_v9 = vrot.slane %v380_v6, 7  ;;  %v389_v10 = vrot.slane %v381_v7, 7  ;;  %1886 = vmatpush3.bf16.msra.mxu0 %v2090_v4  ;;  %1894 = vmatpush3.bf16.msra.mxu1 %v2091_v5  ;;  %v2103_v43 = vld [vmem:[#allocation6] sm:$0xff]   ;;  %v2107_v44 = vld [vmem:[#allocation6 + $0x10] sm:$0xff]   ;;  %v1762_v5 = vld [vmem:[%s2629_s4] ss:$0 sm:$0xff] }
  0x47   : > { %1899 = vmatprep.subr.bf16.mxu0 %v2288_v0  ;;  %1907 = vmatprep.subr.bf16.mxu1 %v2288_v0  ;;  %s369_s16 = scalar_lea.vmem [#allocation9], %s1739_s14  ;;  %v1811_v8 = vld [vmem:[%s2633_s8] ss:$0 sm:$0xff]  ;;  %s1834_s17 = sshll.u32 %s2365_s13, 8 }
  0x48   : > { %v388_v11 = vrot.slane %v387_v9, 4  ;;  %394 = vst.msk [vmem:[#allocation2] sm:$0xe] %vm393_vm5, %v387_v9  ;;  %s1636_s23 = sshll.u32 %s369_s16, 4  ;;  %s2579_s24 = scalar_lea.hbm %s2634_s9, %s1834_s17  ;;  %s2574_s23 = int_to_ptr.vmem [resolvable:$true] %s1636_s23 }
  0x49   : > { %1620 = vst.msk [vmem:[%s369_s16 + $0x4] sm:$0xc] %vm1619_vm9, %v2290_v1  ;;  %1621 = vst.msk [vmem:[%s369_s16 + $0xc] sm:$0xc] %vm1619_vm9, %v2290_v1  ;;  %s2583_s26 = scalar_lea.sflag [#allocation5], %s367_s28  ;;  %s2213_s14 = scalar_lea.vmem %s2574_s23, 256 }
  0x4a   : > { %v390_v12 = vsel %vm2456_vm6, %v388_v11, %v389_v10  ;;  %p2214_p10 = scmp.ne.s32.totalorder %s2574_s23, %s2213_s14  ;;  %p2647_p12 = scmp.ne.s32.totalorder %s2637_s19, 0 }
  0x4b   : > { %396 = vst.msk [vmem:[#allocation2 + $0x4] sm:$0x7] %vm395_vm7, %v390_v12  ;;  %s2292_s13 = smov [#allocation9]  }
  0x4c   : > { %p2215_p2 = pnand %p2214_p10, %p2647_p12  ;;  %s2217_s25 = sshll.u32 %s2292_s13, 4  ;;  %s2218_s25 = int_to_ptr.vmem [resolvable:$false] %s2217_s25 }
  0x4d   : > { %s2219_s27 = scalar_lea.vmem %s2218_s25, 512  ;;  %p2220_p7 = scmp.lt.s32.totalorder %s2574_s23, %s2218_s25 }
  0x4e   : > { %p2216_p4 = pneg %p2215_p2  ;;  %p2221_p8 = scmp.lt.s32.totalorder %s2219_s27, %s2213_s14 }
  0x4f   : > { %v397_v13 = vld [vmem:[#allocation2] sm:$0xf] }
  0x50   : > { %v537_v14 = vld [vmem:[#allocation2] sm:$0xe]  ;;  %p2222_p11 = por %p2221_p8, %p2220_p7 }
  0x51   : > { %v680_v37 = vld [vmem:[#allocation2] sm:$0xc] }
  0x52   : > { %v403_v16 = vld [vmem:[#allocation2 + $0x4] sm:$0x7]  ;;  %p2223_p0 = pnand %p2222_p11, %p2216_p4 }
  0x53   : > { %v398_v17 = vld [vmem:[#allocation2 + $0x4] sm:$0x3]  ;;  %v1742_v19 = vcombine.low %v397_v13, %v403_v16  ;;  %v1750_v34 = vcombine.low %v537_v14, %v403_v16 }
  0x54   : > { %v605_v18 = vld [vmem:[#allocation2 + $0x4] sm:$0xf]  ;;  %v1746_v20 = vcombine.low %v397_v13, %v398_v17 }
  0x55   : > { %v1754_v21 = vcombine.low %v537_v14, %v605_v18  ;;  %v415_v22 = vshrl.u32 %v1742_v19, 16  ;;  %v417_v23 = vshll.u32 %v1742_v19, 16  ;;  %v546_v35 = vrot.slane %v1750_v34, 1 }
  0x56   : > { %1896 = vmatmul.mubr.msk.bf16.vlgmr.msra.gmra.mxu1 %vm433_vm8, %v1746_v20  ;;  %v1758_v38 = vcombine.low %v680_v37, %v605_v18 }
  0x57   : > { %v615_v24 = vshrl.u32 %v1754_v21, 16  ;;  %1908 = vmatpush3.bf16.msra.mxu1 %v2095_v15  ;;  %1911 = vmatprep.mubr.msk.bf16.mxu1 %vm2289_vm1, %v2288_v0  ;;  %v618_v26 = vshll.u32 %v1754_v21, 16  ;;  %v419_v27 = vrot.slane %v417_v23, 1 }
  0x58   : > { %1909 = vmatprep.subr.bf16.mxu1 %v2288_v0  ;;  %v689_v40 = vrot.slane %v1758_v38, 2 }
  0x59   : > { %v617_v28 = vrot.slane %v615_v24, 1  ;;  %v620_v30 = vrot.slane %v618_v26, 2  ;;  %v420_v31 = vor.u32 %v419_v27, %v415_v22  ;;  %v2106_v24 = vld [vmem:[#allocation6 + $0x38] sm:$0xff]  }
  0x5b   : > { %1910 = vmatpush3.bf16.msra.mxu1 %v2097_v25  ;;  %v621_v33 = vor.u32 %v620_v30, %v617_v28  ;;  %1888 = vmatmul.mubr.msk.bf16.vlgmr.msra.gmra.mxu0 %vm433_vm8, %v420_v31 }
  0x5c   : > { %1923 = vmatprep.subr.bf16.mxu1 %v2288_v0  ;;  %1900 = vmatpush3.bf16.msra.mxu0 %v2094_v29 }
  0x5d   : > { %1903 = vmatprep.mubr.msk.bf16.mxu0 %vm2289_vm1, %v2288_v0  ;;  %1901 = vmatprep.subr.bf16.mxu0 %v2288_v0 }
  0x5e   : > { %1912 = vmatmul.mubr.msk.bf16.vlgmr.msra.gmra.mxu1 %vm433_vm8, %v621_v33 }
  0x5f   : > { %1927 = vmatprep.mubr.msk.bf16.mxu1 %vm2289_vm1, %v2288_v0  ;;  %1924 = vmatpush3.bf16.msra.mxu1 %v2104_v42 }
  0x60   : > { %1902 = vmatpush3.bf16.msra.mxu0 %v2096_v32  ;;  %1925 = vmatprep.subr.bf16.mxu1 %v2288_v0 }
  0x61   : > { %1915 = vmatprep.subr.bf16.mxu0 %v2288_v0 }
  0x63   : > { %1904 = vmatmul.mubr.msk.bf16.vlgmr.msra.gmra.mxu0 %vm433_vm8, %v546_v35  ;;  %1926 = vmatpush3.bf16.msra.mxu1 %v2107_v44  ;;  %v2108_v35 = vld [vmem:[#allocation6 + $0x30] sm:$0xff]  }
  0x64   : > { %1916 = vmatpush3.bf16.msra.mxu0 %v2099_v36  ;;  %1919 = vmatprep.mubr.msk.bf16.mxu0 %vm2289_vm1, %v2288_v0 }
  0x65   : > { %1917 = vmatprep.subr.bf16.mxu0 %v2288_v0  ;;  %1939 = vmatprep.subr.bf16.mxu1 %v2288_v0 }
  0x68   : > { %1918 = vmatpush3.bf16.msra.mxu0 %v2100_v39 }
  0x69   : > { %1931 = vmatprep.subr.bf16.mxu0 %v2288_v0 }
  0x6b   : > { %1920 = vmatmul.mubr.msk.bf16.vlgmr.msra.gmra.mxu0 %vm433_vm8, %v689_v40  ;;  %v2110_v40 = vld [vmem:[#allocation6 + $0x28] sm:$0xff]  }
  0x6c   : > { %1935 = vmatprep.mubr.msk.bf16.mxu0 %vm2289_vm1, %v2288_v0  ;;  %1932 = vmatpush3.bf16.msra.mxu0 %v2102_v41 }
  0x6d   : > { %1933 = vmatprep.subr.bf16.mxu0 %v2288_v0 }
  0x70   : > { %1934 = vmatpush3.bf16.msra.mxu0 %v2103_v43  ;;  %v2112_v43 = vld [vmem:[#allocation6 + $0x20] sm:$0xff]  }
  0x71   : > { %1947 = vmatprep.subr.bf16.mxu0 %v2288_v0 }
 0x116   : > { %v530_v45 = vpop.f32.mrf.mxu1 }
 0x118   : > { %v1897_v46 = vpop.f32.mrf.mxu1 }
 0x11a   : > { %v533_v47 = vpop.f32.mrf.mxu1 }
 0x11b   : > { %v471_v48 = vpop.f32.mrf.mxu0 }
 0x11c   : > { %v1898_v49 = vpop.f32.mrf.mxu1  ;;  %v531_v58 = vadd.f32 %v530_v45, %v471_v48  ;;  %v2114_v45 = vld [vmem:[#allocation6 + $0x48] sm:$0xff]  }
 0x11d   : > { %v1889_v50 = vpop.f32.mrf.mxu0 }
 0x11e   : > { %v671_v51 = vpop.f32.mrf.mxu1 }
 0x11f   : > { %v474_v52 = vpop.f32.mrf.mxu0 }
 0x120   : > { %v1913_v53 = vpop.f32.mrf.mxu1  ;;  %v534_v62 = vadd.f32 %v533_v47, %v474_v52  ;;  %v2115_v47 = vld [vmem:[#allocation6 + $0x40] sm:$0xff]   ;;  %v2119_v52 = vld [vmem:[#allocation8 + $0x18] sm:$0xff]  }
 0x121   : > { %v1890_v54 = vpop.f32.mrf.mxu0  ;;  %v2118_v53 = vld [vmem:[#allocation8] sm:$0xff]  }
 0x122   : > { %v674_v55 = vpop.f32.mrf.mxu1  ;;  %v2122_v54 = vld [vmem:[#allocation8 + $0x10] sm:$0xff]  }
 0x123   : > { %v596_v56 = vpop.f32.mrf.mxu0 }
 0x124   : > { %v1914_v57 = vpop.f32.mrf.mxu1  ;;  %v603_v60 = vadd.f32 %v596_v56, %v531_v58 }
 0x125   : > { %v1905_v59 = vpop.f32.mrf.mxu0 }
 0x126   : > { %v678_v2 = vadd.f32 %v671_v51, %v603_v60  ;;  %v2117_v51 = vld [vmem:[#allocation8 + $0x8] sm:$0xff]  }
 0x127   : > { %v599_v61 = vpop.f32.mrf.mxu0 }
 0x128   : > { %v604_v3 = vadd.f32 %v599_v61, %v534_v62 }
 0x129   : > { %v1906_v63 = vpop.f32.mrf.mxu0 }
 0x12a   : > { %v679_v9 = vadd.f32 %v674_v55, %v604_v3 }
 0x12b   : > { %v739_v4 = vpop.f32.mrf.mxu0 }
 0x12c   : > { %v746_v6 = vadd.f32 %v739_v4, %v678_v2 }
 0x12d   : > { %v1921_v7 = vpop.f32.mrf.mxu0 }
 0x12e   : > { %v755_v10 = vadd.f32 %v1762_v5, %v746_v6 }
 0x12f   : > { %v742_v11 = vpop.f32.mrf.mxu0 }
 0x130   : > { %v757_v12 = vmax.f32 %v755_v10, 0.0  ;;  %v747_v13 = vadd.f32 %v742_v11, %v679_v9 }
 0x131   : > { %v1922_v14 = vpop.f32.mrf.mxu0 }
 0x132   : > { %v1826_v15 = vpack.c.bf16 %v757_v12, %v757_v12  ;;  %v756_v16 = vadd.f32 %v1762_v5, %v747_v13 }
 0x134   : > { %v765_v17 = vrot.slane %v1826_v15, 7  ;;  %v758_v18 = vmax.f32 %v756_v16, 0.0  ;;  %v1785_v16 = vld [vmem:[%s2630_s5] ss:$0 sm:$0xff] }
 0x136   : > { %771 = vst.msk [vmem:[#allocation2] sm:$0xe] %vm393_vm5, %v765_v17  ;;  %v1827_v19 = vpack.c.bf16 %v758_v18, %v758_v18  ;;  %v766_v20 = vrot.slane %v765_v17, 4 }
 0x138   : > { %v767_v21 = vrot.slane %v1827_v19, 7 }
 0x13a   : > { %v768_v22 = vsel %vm2456_vm6, %v766_v20, %v767_v21 }
 0x13b   : > { %772 = vst.msk [vmem:[#allocation2 + $0x4] sm:$0x7] %vm395_vm7, %v768_v22 }
 0x13d   : > { %v773_v23 = vld [vmem:[#allocation2] sm:$0xf] }
 0x13e   : > { %v912_v25 = vld [vmem:[#allocation2] sm:$0xe] }
 0x13f   : > { %v1055_v48 = vld [vmem:[#allocation2] sm:$0xc] }
 0x142   : > { %v774_v26 = vld [vmem:[#allocation2 + $0x4] sm:$0x3] }
 0x143   : > { %v779_v27 = vld [vmem:[#allocation2 + $0x4] sm:$0x7]  ;;  %v1769_v29 = vcombine.low %v773_v23, %v774_v26 }
 0x144   : > { %v980_v28 = vld [vmem:[#allocation2 + $0x4] sm:$0xf]  ;;  %v1765_v30 = vcombine.low %v773_v23, %v779_v27  ;;  %v1773_v44 = vcombine.low %v912_v25, %v779_v27 }
 0x145   : > { %v1777_v31 = vcombine.low %v912_v25, %v980_v28  ;;  %1936 = vmatmul.mubr.msk.bf16.vlgmr.msra.gmra.mxu0 %vm433_vm8, %v1769_v29  ;;  %v1781_v49 = vcombine.low %v1055_v48, %v980_v28 }
 0x146   : > { %v793_v32 = vshll.u32 %v1765_v30, 16  ;;  %1948 = vmatpush3.bf16.msra.mxu0 %v2106_v24  ;;  %1951 = vmatprep.mubr.msk.bf16.mxu0 %vm2289_vm1, %v2288_v0  ;;  %v791_v36 = vshrl.u32 %v1765_v30, 16  ;;  %v921_v46 = vrot.slane %v1773_v44, 1 }
 0x147   : > { %v990_v33 = vshrl.u32 %v1777_v31, 16  ;;  %v993_v34 = vshll.u32 %v1777_v31, 16  ;;  %1949 = vmatprep.subr.bf16.mxu0 %v2288_v0  ;;  %v1064_v50 = vrot.slane %v1781_v49, 2 }
 0x148   : > { %v795_v37 = vrot.slane %v793_v32, 1 }
 0x149   : > { %v992_v38 = vrot.slane %v990_v33, 1  ;;  %v995_v39 = vrot.slane %v993_v34, 2  ;;  %v2121_v34 = vld [vmem:[#allocation8 + $0x38] sm:$0xff]  }
 0x14a   : > { %v796_v41 = vor.u32 %v795_v37, %v791_v36  ;;  %1950 = vmatpush3.bf16.msra.mxu0 %v2108_v35 }
 0x14b   : > { %v996_v42 = vor.u32 %v995_v39, %v992_v38  ;;  %1963 = vmatprep.subr.bf16.mxu0 %v2288_v0 }
 0x14c   : > { %1928 = vmatmul.mubr.msk.bf16.vlgmr.msra.gmra.mxu1 %vm433_vm8, %v796_v41 }
 0x14d   : > { %1940 = vmatpush3.bf16.msra.mxu1 %v2110_v40  ;;  %1943 = vmatprep.mubr.msk.bf16.mxu1 %vm2289_vm1, %v2288_v0 }
 0x14e   : > { %1952 = vmatmul.mubr.msk.bf16.vlgmr.msra.gmra.mxu0 %vm433_vm8, %v996_v42  ;;  %1941 = vmatprep.subr.bf16.mxu1 %v2288_v0 }
 0x14f   : > { %1967 = vmatprep.mubr.msk.bf16.mxu0 %vm2289_vm1, %v2288_v0  ;;  %1964 = vmatpush3.bf16.msra.mxu0 %v2119_v52 }
 0x150   : > { %1965 = vmatprep.subr.bf16.mxu0 %v2288_v0 }
 0x151   : > { %1942 = vmatpush3.bf16.msra.mxu1 %v2112_v43 }
 0x152   : > { %1955 = vmatprep.subr.bf16.mxu1 %v2288_v0 }
 0x153   : > { %1966 = vmatpush3.bf16.msra.mxu0 %v2122_v54 }
 0x154   : > { %1944 = vmatmul.mubr.msk.bf16.vlgmr.msra.gmra.mxu1 %vm433_vm8, %v921_v46  ;;  %1979 = vmatprep.subr.bf16.mxu0 %v2288_v0 }
 0x155   : > { %1956 = vmatpush3.bf16.msra.mxu1 %v2114_v45  ;;  %1959 = vmatprep.mubr.msk.bf16.mxu1 %vm2289_vm1, %v2288_v0  ;;  %v2123_v45 = vld [vmem:[#allocation8 + $0x30] sm:$0xff]  }
 0x156   : > { %1957 = vmatprep.subr.bf16.mxu1 %v2288_v0 }
 0x159   : > { %1958 = vmatpush3.bf16.msra.mxu1 %v2115_v47 }
 0x15a   : > { %1971 = vmatprep.subr.bf16.mxu1 %v2288_v0 }
 0x15c   : > { %1960 = vmatmul.mubr.msk.bf16.vlgmr.msra.gmra.mxu1 %vm433_vm8, %v1064_v50  ;;  %v2125_v50 = vld [vmem:[#allocation8 + $0x28] sm:$0xff]  }
 0x15d   : > { %1975 = vmatprep.mubr.msk.bf16.mxu1 %vm2289_vm1, %v2288_v0  ;;  %1972 = vmatpush3.bf16.msra.mxu1 %v2117_v51 }
 0x15e   : > { %1973 = vmatprep.subr.bf16.mxu1 %v2288_v0 }
 0x161   : > { %1974 = vmatpush3.bf16.msra.mxu1 %v2118_v53  ;;  %v2127_v53 = vld [vmem:[#allocation8 + $0x20] sm:$0xff]  }
 0x162   : > { %1987 = vmatprep.subr.bf16.mxu1 %v2288_v0 }
 0x205   : > { %v905_v55 = vpop.f32.mrf.mxu0 }
 0x207   : > { %v1937_v56 = vpop.f32.mrf.mxu0 }
 0x209   : > { %v908_v57 = vpop.f32.mrf.mxu0 }
 0x20b   : > { %v1938_v59 = vpop.f32.mrf.mxu0 }
 0x20c   : > { %v846_v58 = vpop.f32.mrf.mxu1 }
 0x20d   : > { %v906_v6 = vadd.f32 %v905_v55, %v846_v58  ;;  %v2129_v55 = vld [vmem:[#allocation8 + $0x48] sm:$0xff]  }
 0x20e   : > { %v1929_v60 = vpop.f32.mrf.mxu1  ;;  %v1046_v61 = vpop.f32.mrf.mxu0 }
 0x210   : > { %v849_v62 = vpop.f32.mrf.mxu1  ;;  %v1953_v63 = vpop.f32.mrf.mxu0 }
 0x211   : > { %v909_v11 = vadd.f32 %v908_v57, %v849_v62  ;;  %v2130_v57 = vld [vmem:[#allocation8 + $0x40] sm:$0xff]   ;;  %v2133_v62 = vld [vmem:[%s2632_s7] sm:$0xff]  }
 0x212   : > { %v1930_v2 = vpop.f32.mrf.mxu1  ;;  %v1049_v3 = vpop.f32.mrf.mxu0 }
 0x214   : > { %v971_v4 = vpop.f32.mrf.mxu1  ;;  %v1954_v5 = vpop.f32.mrf.mxu0 }
 0x215   : > { %v978_v9 = vadd.f32 %v971_v4, %v906_v6 }
 0x216   : > { %v1945_v7 = vpop.f32.mrf.mxu1 }
 0x217   : > { %v1053_v14 = vadd.f32 %v1046_v61, %v978_v9  ;;  %v2132_v61 = vld [vmem:[%s2632_s7 + $0x8] sm:$0xff]  }
 0x218   : > { %v974_v10 = vpop.f32.mrf.mxu1 }
 0x219   : > { %v979_v13 = vadd.f32 %v974_v10, %v909_v11 }
 0x21a   : > { %v1946_v12 = vpop.f32.mrf.mxu1 }
 0x21b   : > { %v1054_v20 = vadd.f32 %v1049_v3, %v979_v13 }
 0x21c   : > { %v1114_v15 = vpop.f32.mrf.mxu1 }
 0x21d   : > { %v1121_v17 = vadd.f32 %v1114_v15, %v1053_v14 }
 0x21e   : > { %v1961_v18 = vpop.f32.mrf.mxu1 }
 0x21f   : > { %v1130_v19 = vadd.f32 %v1785_v16, %v1121_v17 }
 0x220   : > { %v1117_v21 = vpop.f32.mrf.mxu1 }
 0x221   : > { %v1132_v22 = vmax.f32 %v1130_v19, 0.0  ;;  %v1122_v23 = vadd.f32 %v1117_v21, %v1054_v20 }
 0x222   : > { %v1962_v24 = vpop.f32.mrf.mxu1 }
 0x223   : > { %v1828_v25 = vpack.c.bf16 %v1132_v22, %v1132_v22  ;;  %v1131_v26 = vadd.f32 %v1785_v16, %v1122_v23  ;;  %v1808_v23 = vld [vmem:[%s2631_s6] ss:$0 sm:$0xff] }
 0x225   : > { %v1140_v27 = vrot.slane %v1828_v25, 7  ;;  %v1133_v28 = vmax.f32 %v1131_v26, 0.0 }
 0x227   : > { %1146 = vst.msk [vmem:[#allocation2] sm:$0xe] %vm393_vm5, %v1140_v27  ;;  %v1829_v29 = vpack.c.bf16 %v1133_v28, %v1133_v28  ;;  %v1141_v30 = vrot.slane %v1140_v27, 4 }
 0x229   : > { %v1142_v31 = vrot.slane %v1829_v29, 7 }
 0x22b   : > { %v1143_v32 = vsel %vm2456_vm6, %v1141_v30, %v1142_v31 }
 0x22c   : > { %1147 = vst.msk [vmem:[#allocation2 + $0x4] sm:$0x7] %vm395_vm7, %v1143_v32 }
 0x22e   : > { %v1148_v33 = vld [vmem:[#allocation2] sm:$0xf] }
 0x22f   : > { %v1287_v35 = vld [vmem:[#allocation2] sm:$0xe] }
 0x230   : > { %v1430_v58 = vld [vmem:[#allocation2] sm:$0xc] }
 0x233   : > { %v1149_v36 = vld [vmem:[#allocation2 + $0x4] sm:$0x3] }
 0x234   : > { %v1154_v37 = vld [vmem:[#allocation2 + $0x4] sm:$0x7]  ;;  %v1792_v39 = vcombine.low %v1148_v33, %v1149_v36 }
 0x235   : > { %v1355_v38 = vld [vmem:[#allocation2 + $0x4] sm:$0xf]  ;;  %v1788_v40 = vcombine.low %v1148_v33, %v1154_v37  ;;  %v1796_v54 = vcombine.low %v1287_v35, %v1154_v37 }
 0x236   : > { %v1800_v41 = vcombine.low %v1287_v35, %v1355_v38  ;;  %1976 = vmatmul.mubr.msk.bf16.vlgmr.msra.gmra.mxu1 %vm433_vm8, %v1792_v39  ;;  %v1804_v59 = vcombine.low %v1430_v58, %v1355_v38 }
 0x237   : > { %v1168_v42 = vshll.u32 %v1788_v40, 16  ;;  %1988 = vmatpush3.bf16.msra.mxu1 %v2121_v34  ;;  %1991 = vmatprep.mubr.msk.bf16.mxu1 %vm2289_vm1, %v2288_v0  ;;  %v1166_v46 = vshrl.u32 %v1788_v40, 16  ;;  %v1296_v56 = vrot.slane %v1796_v54, 1 }
 0x238   : > { %v1365_v43 = vshrl.u32 %v1800_v41, 16  ;;  %v1368_v44 = vshll.u32 %v1800_v41, 16  ;;  %1989 = vmatprep.subr.bf16.mxu1 %v2288_v0  ;;  %v1439_v60 = vrot.slane %v1804_v59, 2 }
 0x239   : > { %v1170_v47 = vrot.slane %v1168_v42, 1 }
 0x23a   : > { %v1367_v48 = vrot.slane %v1365_v43, 1  ;;  %v1370_v49 = vrot.slane %v1368_v44, 2 }
 0x23b   : > { %v1171_v51 = vor.u32 %v1170_v47, %v1166_v46  ;;  %1990 = vmatpush3.bf16.msra.mxu1 %v2123_v45 }
 0x23c   : > { %v1371_v52 = vor.u32 %v1370_v49, %v1367_v48  ;;  %2003 = vmatprep.subr.bf16.mxu1 %v2288_v0 }
 0x23d   : > { %1968 = vmatmul.mubr.msk.bf16.vlgmr.msra.gmra.mxu0 %vm433_vm8, %v1171_v51 }
 0x23e   : > { %1980 = vmatpush3.bf16.msra.mxu0 %v2125_v50  ;;  %1983 = vmatprep.mubr.msk.bf16.mxu0 %vm2289_vm1, %v2288_v0 }
 0x23f   : > { %1992 = vmatmul.mubr.msk.bf16.vlgmr.msra.gmra.mxu1 %vm433_vm8, %v1371_v52  ;;  %1981 = vmatprep.subr.bf16.mxu0 %v2288_v0 }
 0x240   : > { %2007 = vmatprep.mubr.msk.bf16.mxu1 %vm2289_vm1, %v2288_v0  ;;  %2004 = vmatpush3.bf16.msra.mxu1 %v2132_v61 }
 0x241   : > { %2005 = vmatprep.subr.bf16.mxu1 %v2288_v0 }
 0x242   : > { %1982 = vmatpush3.bf16.msra.mxu0 %v2127_v53 }
 0x243   : > { %1995 = vmatprep.subr.bf16.mxu0 %v2288_v0 }
 0x244   : > { %2006 = vmatpush3.bf16.msra.mxu1 %v2133_v62 }
 0x245   : > { %1984 = vmatmul.mubr.msk.bf16.vlgmr.msra.gmra.mxu0 %vm433_vm8, %v1296_v56 }
 0x246   : > { %1996 = vmatpush3.bf16.msra.mxu0 %v2129_v55  ;;  %1999 = vmatprep.mubr.msk.bf16.mxu0 %vm2289_vm1, %v2288_v0 }
 0x247   : > { %1997 = vmatprep.subr.bf16.mxu0 %v2288_v0 }
 0x24a   : > { %1998 = vmatpush3.bf16.msra.mxu0 %v2130_v57 }
 0x24d   : > { %2000 = vmatmul.mubr.msk.bf16.vlgmr.msra.gmra.mxu0 %vm433_vm8, %v1439_v60 }
 0x2f6   : > { %v1280_v63 = vpop.f32.mrf.mxu1 }
 0x2f8   : > { %v1977_v2 = vpop.f32.mrf.mxu1 }
 0x2fa   : > { %v1283_v3 = vpop.f32.mrf.mxu1 }
 0x2fc   : > { %v1978_v5 = vpop.f32.mrf.mxu1 }
 0x2fd   : > { %v1221_v4 = vpop.f32.mrf.mxu0 }
 0x2fe   : > { %v1281_v15 = vadd.f32 %v1280_v63, %v1221_v4 }
 0x2ff   : > { %v1969_v6 = vpop.f32.mrf.mxu0  ;;  %v1421_v7 = vpop.f32.mrf.mxu1 }
 0x301   : > { %v1224_v9 = vpop.f32.mrf.mxu0  ;;  %v1993_v10 = vpop.f32.mrf.mxu1 }
 0x302   : > { %v1284_v19 = vadd.f32 %v1283_v3, %v1224_v9 }
 0x303   : > { %v1970_v11 = vpop.f32.mrf.mxu0  ;;  %v1424_v12 = vpop.f32.mrf.mxu1 }
 0x305   : > { %v1346_v13 = vpop.f32.mrf.mxu0  ;;  %v1994_v14 = vpop.f32.mrf.mxu1 }
 0x306   : > { %v1353_v17 = vadd.f32 %v1346_v13, %v1281_v15 }
 0x307   : > { %v1985_v16 = vpop.f32.mrf.mxu0 }
 0x308   : > { %v1428_v21 = vadd.f32 %v1421_v7, %v1353_v17 }
 0x309   : > { %v1349_v18 = vpop.f32.mrf.mxu0 }
 0x30a   : > { %v1354_v20 = vadd.f32 %v1349_v18, %v1284_v19 }
 0x30b   : > { %v1986_v0 = vpop.f32.mrf.mxu0 }
 0x30c   : > { %v1429_v27 = vadd.f32 %v1424_v12, %v1354_v20 }
 0x30d   : > { %v1489_v22 = vpop.f32.mrf.mxu0 }
 0x30e   : > { %v1496_v24 = vadd.f32 %v1489_v22, %v1428_v21 }
 0x30f   : > { %v2001_v25 = vpop.f32.mrf.mxu0 }
 0x310   : > { %v1505_v26 = vadd.f32 %v1808_v23, %v1496_v24 }
 0x311   : > { %v1492_v28 = vpop.f32.mrf.mxu0 }
 0x312   : > { %v1507_v29 = vmax.f32 %v1505_v26, 0.0  ;;  %v1497_v30 = vadd.f32 %v1492_v28, %v1429_v27 }
 0x313   : > { %v2002_v31 = vpop.f32.mrf.mxu0 }
 0x314   : > { %v1830_v32 = vpack.c.bf16 %v1507_v29, %v1507_v29  ;;  %v1506_v33 = vadd.f32 %v1808_v23, %v1497_v30 }
 0x316   : > { %v1515_v34 = vrot.slane %v1830_v32, 7  ;;  %v1508_v35 = vmax.f32 %v1506_v33, 0.0 }
 0x318   : > { %1521 = vst.msk [vmem:[#allocation2] sm:$0xe] %vm393_vm5, %v1515_v34  ;;  %v1831_v36 = vpack.c.bf16 %v1508_v35, %v1508_v35  ;;  %v1516_v37 = vrot.slane %v1515_v34, 4 }
 0x31a   : > { %v1517_v38 = vrot.slane %v1831_v36, 7 }
 0x31c   : > { %v1518_v39 = vsel %vm2456_vm6, %v1516_v37, %v1517_v38 }
 0x31d   : > { %1522 = vst.msk [vmem:[#allocation2 + $0x4] sm:$0x7] %vm395_vm7, %v1518_v39 }
 0x324   : > { %v2134_v40 = vld [vmem:[#allocation2] sm:$0x7e]  }
 0x325   : > { %v1541_v41 = vrot.slane %v2134_v40, 1 }
 0x327   : > { %2008 = vmatmul.mubr.msk.bf16.vlgmr.msra.gmra.mxu1 %vm433_vm8, %v1541_v41 }
 0x3e7   : > { %v1591_v42 = vpop.f32.mrf.mxu1 }
 0x3e8   : > { %v1592_v43 = vadd.f32 %v1811_v8, %v1591_v42 }
 0x3e9   : > { %v2009_v44 = vpop.f32.mrf.mxu1 }
 0x3ea   : > { %v1832_v45 = vpack.c.bf16 %v1592_v43, %v1592_v43 }
 0x3eb   : > { %v1594_v46 = vpop.f32.mrf.mxu1 }
 0x3ec   : > { %v1595_v47 = vadd.f32 %v1811_v8, %v1594_v46  ;;  %1610 = vrot.lane.b32.xlu0 %v1832_v45, %s2291_s29  ;;  %1607 = vst.msk [vmem:[%s369_s16] sm:$0xf] %vm1606_vm10, %v1832_v45 }
 0x3ed   : > { %v2010_v48 = vpop.f32.mrf.mxu1 }
 0x3ee   : > { %v1833_v1 = vpack.c.bf16 %v1595_v47, %v1595_v47 }
 0x3f0   : > { %1612 = vrot.lane.b32.xlu0 %v1833_v1, %s2291_s29  ;;  %1609 = vst.msk [vmem:[%s369_s16 + $0x4] sm:$0x3] %vm1608_vm11, %v1833_v1 }
 0x45e   : > { %v1611_v49 = vpop.permute.xlu0 %1610 }
 0x45f   : > { %1818 = vst.msk [vmem:[%s369_s16 + $0x8] sm:$0xf] %vm1606_vm10, %v1611_v49 }
 0x462   : > { %v1613_v50 = vpop.permute.xlu0 %1612 }
 0x463   : > { %1819 = vst.msk [vmem:[%s369_s16 + $0xc] sm:$0x3] %vm1608_vm11, %v1613_v50 }
 0x464   : > { %2226 = shalt.err (!%p2223_p0)
}
 0x465   : > { %s2227_s28 = scalar_lea.hbm %s2579_s24, 256  ;;  %s2231_s22 = scalar_lea.hbm %s2634_s9, 512 }
 0x466   : > { %p2228_p6 = scmp.ne.s32.totalorder %s2579_s24, %s2227_s28  ;;  %p2232_p1 = scmp.lt.s32.totalorder %s2579_s24, %s2634_s9 }
 0x467   : > { %p2233_p5 = scmp.lt.s32.totalorder %s2231_s22, %s2227_s28 }
 0x468   : > { %p2229_p9 = pnand %p2228_p6, %p2647_p12 }
 0x469   : > { %p2234_p3 = por %p2233_p5, %p2232_p1 }
 0x46a   : > { %p2230_p13 = pneg %p2229_p9 }
 0x46c   : > { %p2235_p10 = pnand %p2234_p3, %p2230_p13 }
 0x46e   : > { %2238 = shalt.err (!%p2235_p10)
}
 0x46f   : > { %s2293_s14 = smov 4  }
 0x470   : > { %2023 = dma.vmem_to_hbm [thread:$0]  (%p2647_p12), %s2574_s23, 256, %s2579_s24, %s2583_s26, %s2291_s29, %s2291_s29, %s2293_s14  }
 0x471 PF: > { %p2045_p2 = scmp.ge.s32.totalorder %s2281_s12, 2  ;;  %s1651_s25 = sand.u32 1, %s2269_s30  }
 0x472   : > { %p2648_p4 = scmp.ne.s32.totalorder %s2638_s20, 0  ;;  %s1652_s27 = scalar_lea.sflag [#allocation5], %s1651_s25 }
 0x474   : > { %p2036_p7 = pnand %p2045_p2, %p2648_p4 }
 0x476   : > { %p2037_p8 = pneg %p2036_p7 }
 0x478   : > { %2264 = dma.done.wait (%p2037_p8), %s1652_s27, 256  }
 0x479   : > { %2266 = vsyncadd (%p2037_p8), %s1652_s27, 4294967040  ;;  %p21_p11 = scmp.ge.s32.totalorder %s2369_s15, 4   ;;  %s2649_s30 = smov %s2273_s10 }
 0x47a   : > { %s2650_s10 = smov %s2277_s11  ;;  %s2651_s11 = smov %s2380_s18 }
 0x47b   : > { %s2652_s12 = smov %s2369_s15  ;;  %23 = sbr.rel (!%p21_p11) target bundleno = 5 (0x5), region = 117 }
 0x480   :  { %1657 = vsyncpa [#allocation4], 1 }
 0x481   :  { %1659 = vsyncpa [#allocation4 + $0x1], 1 }
 0x482   :  { %1660 = vsyncpa [#allocation7], 1 }
 0x483   :  { %1661 = vsyncpa [#allocation5], 1 }
 0x484   :  { %1663 = vsyncpa [#allocation5 + $0x1], 1 }

// kernel: tpu_custom_call.1
= control target key start
LH: loop header
LB: loop body
LE: loop exit
PB: predicated region body
PF: predicated region fallthrough
CT: control target
= control target key end

     0   :  { %14 = vsyncpa [#allocation4], 0  ;;  %s2625_s0 = inlined_call_operand.vmem [shape: bf16[2,12,32], index: 0, kind: input, shape index: {}]   ;;  %s2626_s1 = inlined_call_operand.hbm [shape: bf16[5,32,32], index: 1, kind: input, shape index: {}]   ;;  %s2627_s2 = inlined_call_operand.hbm [shape: bf16[5,32,32], index: 2, kind: input, shape index: {}]   ;;  %s2628_s3 = inlined_call_operand.hbm [shape: bf16[5,32,32], index: 3, kind: input, shape index: {}]   ;;  %s2629_s4 = inlined_call_operand.vmem [shape: f32[1,32], index: 4, kind: input, shape index: {}]   ;;  %s2630_s5 = inlined_call_operand.vmem [shape: f32[1,32], index: 5, kind: input, shape index: {}]   ;;  %s2631_s6 = inlined_call_operand.vmem [shape: f32[1,32], index: 6, kind: input, shape index: {}]   ;;  %s2632_s7 = inlined_call_operand.vmem [shape: bf16[32,128], index: 7, kind: input, shape index: {}]   ;;  %s2633_s8 = inlined_call_operand.vmem [shape: f32[1,128], index: 8, kind: input, shape index: {}]   ;;  %s2634_s9 = inlined_call_operand.hbm [shape: bf16[2,2,16,64], index: 9, kind: output, shape index: {}]  }
   0x1   :  { %15 = vsyncpa [#allocation7], 0 }
   0x2   :  { %16 = vsyncpa [#allocation5], 0 }
   0x3   :  { %18 = vsyncpa [#allocation5 + $0x1], 0  ;;  %s2344_s30 = smov 0   ;;  %s2346_s10 = smov 0  }
   0x4   :  { %s2348_s11 = smov 0   ;;  %s2350_s12 = smov 0  }
   0x5 LB: > { %s2365_s13 = sadd.s32 4294967295, %s2281_s12   ;;  %s1729_s14 = sadd.s32 4294967294, %s2281_s12   ;;  %s2281_s12 = sphi %s2350_s12, %s2652_s12   ;;  %s2277_s11 = sphi %s2348_s11, %s2651_s11   ;;  %s2273_s10 = sphi %s2346_s10, %s2650_s10   ;;  %s2269_s30 = sphi %s2344_s30, %s2649_s30  }
   0x6   : > { %s2369_s15 = sadd.s32 1, %s2281_s12   ;;  %s225_s16 = sadd.s32 1, %s2277_s11 }
   0x7   : > { %s222_s17 = ssub.s32 %s2281_s12, %s2369_s15  ;;  %p235_p0 = scmp.ne.s32.totalorder %s2277_s11, %s2273_s10 }
   0x8   : > { %p223_p1 = scmp.eq.s32.totalorder %s222_s17, 0  ;;  %p236_p2 = scmp.eq.s32.totalorder %s2365_s13, 1 }
   0x9   : > { %p241_p3 = scmp.ne.s32.totalorder %s2273_s10, %s2269_s30  ;;  %p242_p4 = scmp.eq.s32.totalorder %s1729_s14, 1 }
   0xa   : > { %s2380_s18 = scalar_select %p223_p1, %s2277_s11, %s225_s16  }
   0xb   : > { %p2382_p5 = por %p236_p2, %p235_p0  ;;  %p2386_p6 = por %p242_p4, %p241_p3 }
   0xc   : > { %p1730_p7 = scmp.ge.s32.totalorder %s2281_s12, 1  ;;  %p249_p8 = scmp.lt.s32.totalorder %s2281_s12, 3 }
   0xd   : > { %s2637_s19 = scalar_select %p2382_p5, 1, 0 }
   0xe   : > { %s2638_s20 = scalar_select %p2386_p6, 1, 0 }
   0xf   : > { %p2635_p9 = scmp.eq.s32.totalorder %s2365_s13, 0  ;;  %p2393_p10 = pnand %p1730_p7, %p249_p8 }
  0x10   : > { %s2283_s22 = smov [#allocation6]   ;;  %s2284_s25 = smov [#allocation3]  }
  0x11   : > { %p2025_p11 = pneg %p2393_p10  ;;  %s274_s23 = sshll.u32 %s2283_s22, 4  ;;  %s275_s23 = int_to_ptr.vmem [resolvable:$true] %s274_s23 }
  0x12   : > { %s261_s26 = sshll.u32 %s2284_s25, 4  ;;  %s2285_s27 = smov [#allocation8]   ;;  %s262_s26 = int_to_ptr.vmem [resolvable:$true] %s261_s26 }
  0x13   : > { %p2401_p12 = pnand %p2635_p9, %p2025_p11  ;;  %s287_s28 = sshll.u32 %s2285_s27, 4  ;;  %s288_s28 = int_to_ptr.vmem [resolvable:$true] %s287_s28 }
  0x14   : > { %s2146_s29 = scalar_lea.vmem %s275_s23, 1280  ;;  %p2154_p3 = scmp.lt.s32.totalorder %s275_s23, %s275_s23 }
  0x15   : > { %p2137_p13 = pneg %p2401_p12  ;;  %p2147_p0 = scmp.ne.s32.totalorder %s275_s23, %s2146_s29 }
  0x16   : > { %p2155_p4 = scmp.lt.s32.totalorder %s2146_s29, %s2146_s29 }
  0x17   : > { %p2149_p1 = pnand %p2147_p0, %p2137_p13 }
  0x18   : > { %p2156_p7 = por %p2155_p4, %p2154_p3 }
  0x19   : > { %p2150_p2 = pneg %p2149_p1 }
  0x1b   : > { %p2157_p8 = pnand %p2156_p7, %p2150_p2 }
  0x1d   : > { %2160 = shalt.err (!%p2157_p8)
}
  0x1e   : > { %s2286_s14 = smov 64   ;;  %s2287_s16 = smov 4  }
  0x1f   : > { %2031 = dma.hbm_to_vmem [thread:$0]  (!%p2401_p12), %s2627_s2, 1280, %s275_s23, [#allocation7], %s2286_s14, %s2286_s14, %s2287_s16  }
  0x20   : > { %s2172_s25 = scalar_lea.vmem %s262_s26, 1280  ;;  %p2180_p9 = scmp.lt.s32.totalorder %s262_s26, %s262_s26 }
  0x21   : > { %p2173_p11 = scmp.ne.s32.totalorder %s262_s26, %s2172_s25  ;;  %p2181_p6 = scmp.lt.s32.totalorder %s2172_s25, %s2172_s25 }
  0x23   : > { %p2175_p0 = pnand %p2173_p11, %p2137_p13  ;;  %p2182_p3 = por %p2181_p6, %p2180_p9 }
  0x25   : > { %p2176_p1 = pneg %p2175_p0 }
  0x27   : > { %p2183_p2 = pnand %p2182_p3, %p2176_p1 }
  0x29   : > { %2186 = shalt.err (!%p2183_p2)
}
  0x2a   : > { %2028 = dma.hbm_to_vmem [thread:$0]  (!%p2401_p12), %s2626_s1, 1280, %s262_s26, [#allocation4], %s2286_s14, %s2286_s14, %s2287_s16  }
  0x2b   : > { %s2198_s23 = scalar_lea.vmem %s288_s28, 1280  ;;  %p2206_p11 = scmp.lt.s32.totalorder %s288_s28, %s288_s28 }
  0x2c   : > { %p2199_p4 = scmp.ne.s32.totalorder %s288_s28, %s2198_s23  ;;  %p2207_p0 = scmp.lt.s32.totalorder %s2198_s23, %s2198_s23 }
  0x2e   : > { %p2201_p7 = pnand %p2199_p4, %p2137_p13  ;;  %p2208_p5 = por %p2207_p0, %p2206_p11 }
  0x30   : > { %p2202_p8 = pneg %p2201_p7 }
  0x32   : > { %p2209_p6 = pnand %p2208_p5, %p2202_p8 }
  0x34   : > { %2212 = shalt.err (!%p2209_p6)
}
  0x35   : > { %2034 = dma.hbm_to_vmem [thread:$0]  (!%p2401_p12), %s2628_s3, 1280, %s288_s28, [#allocation7], %s2286_s14, %s2286_s14, %s2287_s16  }
  0x36   : > { %326 = sbr.rel (%p2393_p10) target bundleno = 1137 (0x471), region = 56  ;;  %p2641_p9 = scmp.eq.s32.totalorder (!%p2393_p10), %s2365_s13, 0 }
  0x3b   : > { %2256 = dma.done.wait (%p2641_p9), [#allocation4], 1280   ;;  %p2642_p13 = pmov %p2641_p9 }
  0x3c   : > { %p2643_p1 = pmov %p2641_p9 }
  0x3d   : > { %2258 = vsyncadd (%p2642_p13), [#allocation4], 4294966016 }
  0x3e   : > { %2260 = dma.done.wait (%p2643_p1), [#allocation7], 2560   ;;  %p2644_p5 = pmov %p2643_p1 }
  0x3f   : > { %p370_p3 = scmp.lt.s32.totalorder %s2365_s13, 1  ;;  %vm376_vm0 = vcmask 253952   ;;  %v2288_v0 = vmov 0.0   ;;  %vm2289_vm1 = vmmov 0   ;;  %v2290_v1 = vmov 0   ;;  %v2088_v2 = vld [vmem:[#allocation3 + $0x18] sm:$0xff]  }
  0x40   : > { %2262 = vsyncadd (%p2644_p5), [#allocation7], 4294964736  ;;  %1883 = vmatprep.subr.bf16.mxu0 %v2288_v0  ;;  %1891 = vmatprep.subr.bf16.mxu1 %v2288_v0  ;;  %377 = vst.msk [vmem:[#allocation2] sm:$0x1] %vm376_vm0, %v2290_v1  ;;  %vm378_vm2 = vcmask 257027   ;;  %v2089_v3 = vld [vmem:[#allocation3 + $0x8] sm:$0xff]  }
  0x41   : > { %1887 = vmatprep.mubr.msk.bf16.mxu0 %vm2289_vm1, %v2288_v0  ;;  %1895 = vmatprep.mubr.msk.bf16.mxu1 %vm2289_vm1, %v2288_v0  ;;  %s371_s21 = scalar_select %p370_p3, %s2365_s13, 1  ;;  %379 = vst.msk [vmem:[#allocation2 + $0x4] sm:$0x8] %vm378_vm2, %v2290_v1  ;;  %vm384_vm3 = vcmask 1040384   ;;  %v2090_v4 = vld [vmem:[#allocation3 + $0x10] sm:$0xff]   ;;  %vm385_vm4 = vcmask 1044484  }
  0x42   : > { %1884 = vmatpush3.bf16.msra.mxu0 %v2088_v2  ;;  %1892 = vmatpush3.bf16.msra.mxu1 %v2089_v3  ;;  %v2091_v5 = vld [vmem:[#allocation3] sm:$0xff]   ;;  %vm393_vm5 = vcmask 257025   ;;  %vm2456_vm6 = vmor %vm384_vm3, %vm385_vm4  ;;  %vm395_vm7 = vcmask 256000   ;;  %vm433_vm8 = vcmask 261120   ;;  %v2095_v15 = vld [vmem:[#allocation3 + $0x38] sm:$0xff]   ;;  %s367_s28 = sand.u32 1, %s2273_s10  }
  0x43   : > { %s1825_s24 = sshll.u32 %s371_s21, 3  ;;  %1885 = vmatprep.subr.bf16.mxu0 %v2288_v0  ;;  %1893 = vmatprep.subr.bf16.mxu1 %v2288_v0  ;;  %v2097_v25 = vld [vmem:[#allocation3 + $0x30] sm:$0xff]   ;;  %v2094_v29 = vld [vmem:[#allocation3 + $0x28] sm:$0xff]   ;;  %v2096_v32 = vld [vmem:[#allocation3 + $0x20] sm:$0xff]   ;;  %vm1619_vm9 = vcmask 519170   ;;  %vm1606_vm10 = vcmask 519168  }
  0x44   : > { %s374_s14 = scalar_lea.vmem %s2625_s0, %s1825_s24  ;;  %v2099_v36 = vld [vmem:[#allocation3 + $0x48] sm:$0xff]   ;;  %v2100_v39 = vld [vmem:[#allocation3 + $0x40] sm:$0xff]   ;;  %v2102_v41 = vld [vmem:[#allocation6 + $0x8] sm:$0xff]   ;;  %s2291_s29 = smov 64   ;;  %vm1608_vm11 = vcmask 517120  }
  0x45   : > { %v380_v6 = vld [vmem:[%s374_s14] sm:$0xf]  ;;  %v381_v7 = vld [vmem:[%s374_s14 + $0x4] sm:$0x3]  ;;  %v2104_v42 = vld [vmem:[#allocation6 + $0x18] sm:$0xff]   ;;  %s1739_s14 = sshll.u32 %s367_s28, 4 }
  0x46   : > { %v387_v9 = vrot.slane %v380_v6, 7  ;;  %v389_v10 = vrot.slane %v381_v7, 7  ;;  %1886 = vmatpush3.bf16.msra.mxu0 %v2090_v4  ;;  %1894 = vmatpush3.bf16.msra.mxu1 %v2091_v5  ;;  %v2103_v43 = vld [vmem:[#allocation6] sm:$0xff]   ;;  %v2107_v44 = vld [vmem:[#allocation6 + $0x10] sm:$0xff]   ;;  %v1762_v5 = vld [vmem:[%s2629_s4] ss:$0 sm:$0xff] }
  0x47   : > { %1899 = vmatprep.subr.bf16.mxu0 %v2288_v0  ;;  %1907 = vmatprep.subr.bf16.mxu1 %v2288_v0  ;;  %s369_s16 = scalar_lea.vmem [#allocation9], %s1739_s14  ;;  %v1811_v8 = vld [vmem:[%s2633_s8] ss:$0 sm:$0xff]  ;;  %s1834_s17 = sshll.u32 %s2365_s13, 8 }
  0x48   : > { %v388_v11 = vrot.slane %v387_v9, 4  ;;  %394 = vst.msk [vmem:[#allocation2] sm:$0xe] %vm393_vm5, %v387_v9  ;;  %s1636_s23 = sshll.u32 %s369_s16, 4  ;;  %s2579_s24 = scalar_lea.hbm %s2634_s9, %s1834_s17  ;;  %s2574_s23 = int_to_ptr.vmem [resolvable:$true] %s1636_s23 }
  0x49   : > { %1620 = vst.msk [vmem:[%s369_s16 + $0x4] sm:$0xc] %vm1619_vm9, %v2290_v1  ;;  %1621 = vst.msk [vmem:[%s369_s16 + $0xc] sm:$0xc] %vm1619_vm9, %v2290_v1  ;;  %s2583_s26 = scalar_lea.sflag [#allocation5], %s367_s28  ;;  %s2213_s14 = scalar_lea.vmem %s2574_s23, 256 }
  0x4a   : > { %v390_v12 = vsel %vm2456_vm6, %v388_v11, %v389_v10  ;;  %p2214_p10 = scmp.ne.s32.totalorder %s2574_s23, %s2213_s14  ;;  %p2647_p12 = scmp.ne.s32.totalorder %s2637_s19, 0 }
  0x4b   : > { %396 = vst.msk [vmem:[#allocation2 + $0x4] sm:$0x7] %vm395_vm7, %v390_v12  ;;  %s2292_s13 = smov [#allocation9]  }
  0x4c   : > { %p2215_p2 = pnand %p2214_p10, %p2647_p12  ;;  %s2217_s25 = sshll.u32 %s2292_s13, 4  ;;  %s2218_s25 = int_to_ptr.vmem [resolvable:$false] %s2217_s25 }
  0x4d   : > { %s2219_s27 = scalar_lea.vmem %s2218_s25, 512  ;;  %p2220_p7 = scmp.lt.s32.totalorder %s2574_s23, %s2218_s25 }
  0x4e   : > { %p2216_p4 = pneg %p2215_p2  ;;  %p2221_p8 = scmp.lt.s32.totalorder %s2219_s27, %s2213_s14 }
  0x4f   : > { %v397_v13 = vld [vmem:[#allocation2] sm:$0xf] }
  0x50   : > { %v537_v14 = vld [vmem:[#allocation2] sm:$0xe]  ;;  %p2222_p11 = por %p2221_p8, %p2220_p7 }
  0x51   : > { %v680_v37 = vld [vmem:[#allocation2] sm:$0xc] }
  0x52   : > { %v403_v16 = vld [vmem:[#allocation2 + $0x4] sm:$0x7]  ;;  %p2223_p0 = pnand %p2222_p11, %p2216_p4 }
  0x53   : > { %v398_v17 = vld [vmem:[#allocation2 + $0x4] sm:$0x3]  ;;  %v1742_v19 = vcombine.low %v397_v13, %v403_v16  ;;  %v1750_v34 = vcombine.low %v537_v14, %v403_v16 }
  0x54   : > { %v605_v18 = vld [vmem:[#allocation2 + $0x4] sm:$0xf]  ;;  %v1746_v20 = vcombine.low %v397_v13, %v398_v17 }
  0x55   : > { %v1754_v21 = vcombine.low %v537_v14, %v605_v18  ;;  %v415_v22 = vshrl.u32 %v1742_v19, 16  ;;  %v417_v23 = vshll.u32 %v1742_v19, 16  ;;  %v546_v35 = vrot.slane %v1750_v34, 1 }
  0x56   : > { %1896 = vmatmul.mubr.msk.bf16.vlgmr.msra.gmra.mxu1 %vm433_vm8, %v1746_v20  ;;  %v1758_v38 = vcombine.low %v680_v37, %v605_v18 }
  0x57   : > { %v615_v24 = vshrl.u32 %v1754_v21, 16  ;;  %1908 = vmatpush3.bf16.msra.mxu1 %v2095_v15  ;;  %1911 = vmatprep.mubr.msk.bf16.mxu1 %vm2289_vm1, %v2288_v0  ;;  %v618_v26 = vshll.u32 %v1754_v21, 16  ;;  %v419_v27 = vrot.slane %v417_v23, 1 }
  0x58   : > { %1909 = vmatprep.subr.bf16.mxu1 %v2288_v0  ;;  %v689_v40 = vrot.slane %v1758_v38, 2 }
  0x59   : > { %v617_v28 = vrot.slane %v615_v24, 1  ;;  %v620_v30 = vrot.slane %v618_v26, 2  ;;  %v420_v31 = vor.u32 %v419_v27, %v415_v22  ;;  %v2106_v24 = vld [vmem:[#allocation6 + $0x38] sm:$0xff]  }
  0x5b   : > { %1910 = vmatpush3.bf16.msra.mxu1 %v2097_v25  ;;  %v621_v33 = vor.u32 %v620_v30, %v617_v28  ;;  %1888 = vmatmul.mubr.msk.bf16.vlgmr.msra.gmra.mxu0 %vm433_vm8, %v420_v31 }
  0x5c   : > { %1923 = vmatprep.subr.bf16.mxu1 %v2288_v0  ;;  %1900 = vmatpush3.bf16.msra.mxu0 %v2094_v29 }
  0x5d   : > { %1903 = vmatprep.mubr.msk.bf16.mxu0 %vm2289_vm1, %v2288_v0  ;;  %1901 = vmatprep.subr.bf16.mxu0 %v2288_v0 }
  0x5e   : > { %1912 = vmatmul.mubr.msk.bf16.vlgmr.msra.gmra.mxu1 %vm433_vm8, %v621_v33 }
  0x5f   : > { %1927 = vmatprep.mubr.msk.bf16.mxu1 %vm2289_vm1, %v2288_v0  ;;  %1924 = vmatpush3.bf16.msra.mxu1 %v2104_v42 }
  0x60   : > { %1902 = vmatpush3.bf16.msra.mxu0 %v2096_v32  ;;  %1925 = vmatprep.subr.bf16.mxu1 %v2288_v0 }
  0x61   : > { %1915 = vmatprep.subr.bf16.mxu0 %v2288_v0 }
  0x63   : > { %1904 = vmatmul.mubr.msk.bf16.vlgmr.msra.gmra.mxu0 %vm433_vm8, %v546_v35  ;;  %1926 = vmatpush3.bf16.msra.mxu1 %v2107_v44  ;;  %v2108_v35 = vld [vmem:[#allocation6 + $0x30] sm:$0xff]  }
  0x64   : > { %1916 = vmatpush3.bf16.msra.mxu0 %v2099_v36  ;;  %1919 = vmatprep.mubr.msk.bf16.mxu0 %vm2289_vm1, %v2288_v0 }
  0x65   : > { %1917 = vmatprep.subr.bf16.mxu0 %v2288_v0  ;;  %1939 = vmatprep.subr.bf16.mxu1 %v2288_v0 }
  0x68   : > { %1918 = vmatpush3.bf16.msra.mxu0 %v2100_v39 }
  0x69   : > { %1931 = vmatprep.subr.bf16.mxu0 %v2288_v0 }
  0x6b   : > { %1920 = vmatmul.mubr.msk.bf16.vlgmr.msra.gmra.mxu0 %vm433_vm8, %v689_v40  ;;  %v2110_v40 = vld [vmem:[#allocation6 + $0x28] sm:$0xff]  }
  0x6c   : > { %1935 = vmatprep.mubr.msk.bf16.mxu0 %vm2289_vm1, %v2288_v0  ;;  %1932 = vmatpush3.bf16.msra.mxu0 %v2102_v41 }
  0x6d   : > { %1933 = vmatprep.subr.bf16.mxu0 %v2288_v0 }
  0x70   : > { %1934 = vmatpush3.bf16.msra.mxu0 %v2103_v43  ;;  %v2112_v43 = vld [vmem:[#allocation6 + $0x20] sm:$0xff]  }
  0x71   : > { %1947 = vmatprep.subr.bf16.mxu0 %v2288_v0 }
 0x116   : > { %v530_v45 = vpop.f32.mrf.mxu1 }
 0x118   : > { %v1897_v46 = vpop.f32.mrf.mxu1 }
 0x11a   : > { %v533_v47 = vpop.f32.mrf.mxu1 }
 0x11b   : > { %v471_v48 = vpop.f32.mrf.mxu0 }
 0x11c   : > { %v1898_v49 = vpop.f32.mrf.mxu1  ;;  %v531_v58 = vadd.f32 %v530_v45, %v471_v48  ;;  %v2114_v45 = vld [vmem:[#allocation6 + $0x48] sm:$0xff]  }
 0x11d   : > { %v1889_v50 = vpop.f32.mrf.mxu0 }
 0x11e   : > { %v671_v51 = vpop.f32.mrf.mxu1 }
 0x11f   : > { %v474_v52 = vpop.f32.mrf.mxu0 }
 0x120   : > { %v1913_v53 = vpop.f32.mrf.mxu1  ;;  %v534_v62 = vadd.f32 %v533_v47, %v474_v52  ;;  %v2115_v47 = vld [vmem:[#allocation6 + $0x40] sm:$0xff]   ;;  %v2119_v52 = vld [vmem:[#allocation8 + $0x18] sm:$0xff]  }
 0x121   : > { %v1890_v54 = vpop.f32.mrf.mxu0  ;;  %v2118_v53 = vld [vmem:[#allocation8] sm:$0xff]  }
 0x122   : > { %v674_v55 = vpop.f32.mrf.mxu1  ;;  %v2122_v54 = vld [vmem:[#allocation8 + $0x10] sm:$0xff]  }
 0x123   : > { %v596_v56 = vpop.f32.mrf.mxu0 }
 0x124   : > { %v1914_v57 = vpop.f32.mrf.mxu1  ;;  %v603_v60 = vadd.f32 %v596_v56, %v531_v58 }
 0x125   : > { %v1905_v59 = vpop.f32.mrf.mxu0 }
 0x126   : > { %v678_v2 = vadd.f32 %v671_v51, %v603_v60  ;;  %v2117_v51 = vld [vmem:[#allocation8 + $0x8] sm:$0xff]  }
 0x127   : > { %v599_v61 = vpop.f32.mrf.mxu0 }
 0x128   : > { %v604_v3 = vadd.f32 %v599_v61, %v534_v62 }
 0x129   : > { %v1906_v63 = vpop.f32.mrf.mxu0 }
 0x12a   : > { %v679_v9 = vadd.f32 %v674_v55, %v604_v3 }
 0x12b   : > { %v739_v4 = vpop.f32.mrf.mxu0 }
 0x12c   : > { %v746_v6 = vadd.f32 %v739_v4, %v678_v2 }
 0x12d   : > { %v1921_v7 = vpop.f32.mrf.mxu0 }
 0x12e   : > { %v755_v10 = vadd.f32 %v1762_v5, %v746_v6 }
 0x12f   : > { %v742_v11 = vpop.f32.mrf.mxu0 }
 0x130   : > { %v757_v12 = vmax.f32 %v755_v10, 0.0  ;;  %v747_v13 = vadd.f32 %v742_v11, %v679_v9 }
 0x131   : > { %v1922_v14 = vpop.f32.mrf.mxu0 }
 0x132   : > { %v1826_v15 = vpack.c.bf16 %v757_v12, %v757_v12  ;;  %v756_v16 = vadd.f32 %v1762_v5, %v747_v13 }
 0x134   : > { %v765_v17 = vrot.slane %v1826_v15, 7  ;;  %v758_v18 = vmax.f32 %v756_v16, 0.0  ;;  %v1785_v16 = vld [vmem:[%s2630_s5] ss:$0 sm:$0xff] }
 0x136   : > { %771 = vst.msk [vmem:[#allocation2] sm:$0xe] %vm393_vm5, %v765_v17  ;;  %v1827_v19 = vpack.c.bf16 %v758_v18, %v758_v18  ;;  %v766_v20 = vrot.slane %v765_v17, 4 }
 0x138   : > { %v767_v21 = vrot.slane %v1827_v19, 7 }
 0x13a   : > { %v768_v22 = vsel %vm2456_vm6, %v766_v20, %v767_v21 }
 0x13b   : > { %772 = vst.msk [vmem:[#allocation2 + $0x4] sm:$0x7] %vm395_vm7, %v768_v22 }
 0x13d   : > { %v773_v23 = vld [vmem:[#allocation2] sm:$0xf] }
 0x13e   : > { %v912_v25 = vld [vmem:[#allocation2] sm:$0xe] }
 0x13f   : > { %v1055_v48 = vld [vmem:[#allocation2] sm:$0xc] }
 0x142   : > { %v774_v26 = vld [vmem:[#allocation2 + $0x4] sm:$0x3] }
 0x143   : > { %v779_v27 = vld [vmem:[#allocation2 + $0x4] sm:$0x7]  ;;  %v1769_v29 = vcombine.low %v773_v23, %v774_v26 }
 0x144   : > { %v980_v28 = vld [vmem:[#allocation2 + $0x4] sm:$0xf]  ;;  %v1765_v30 = vcombine.low %v773_v23, %v779_v27  ;;  %v1773_v44 = vcombine.low %v912_v25, %v779_v27 }
 0x145   : > { %v1777_v31 = vcombine.low %v912_v25, %v980_v28  ;;  %1936 = vmatmul.mubr.msk.bf16.vlgmr.msra.gmra.mxu0 %vm433_vm8, %v1769_v29  ;;  %v1781_v49 = vcombine.low %v1055_v48, %v980_v28 }
 0x146   : > { %v793_v32 = vshll.u32 %v1765_v30, 16  ;;  %1948 = vmatpush3.bf16.msra.mxu0 %v2106_v24  ;;  %1951 = vmatprep.mubr.msk.bf16.mxu0 %vm2289_vm1, %v2288_v0  ;;  %v791_v36 = vshrl.u32 %v1765_v30, 16  ;;  %v921_v46 = vrot.slane %v1773_v44, 1 }
 0x147   : > { %v990_v33 = vshrl.u32 %v1777_v31, 16  ;;  %v993_v34 = vshll.u32 %v1777_v31, 16  ;;  %1949 = vmatprep.subr.bf16.mxu0 %v2288_v0  ;;  %v1064_v50 = vrot.slane %v1781_v49, 2 }
 0x148   : > { %v795_v37 = vrot.slane %v793_v32, 1 }
 0x149   : > { %v992_v38 = vrot.slane %v990_v33, 1  ;;  %v995_v39 = vrot.slane %v993_v34, 2  ;;  %v2121_v34 = vld [vmem:[#allocation8 + $0x38] sm:$0xff]  }
 0x14a   : > { %v796_v41 = vor.u32 %v795_v37, %v791_v36  ;;  %1950 = vmatpush3.bf16.msra.mxu0 %v2108_v35 }
 0x14b   : > { %v996_v42 = vor.u32 %v995_v39, %v992_v38  ;;  %1963 = vmatprep.subr.bf16.mxu0 %v2288_v0 }
 0x14c   : > { %1928 = vmatmul.mubr.msk.bf16.vlgmr.msra.gmra.mxu1 %vm433_vm8, %v796_v41 }
 0x14d   : > { %1940 = vmatpush3.bf16.msra.mxu1 %v2110_v40  ;;  %1943 = vmatprep.mubr.msk.bf16.mxu1 %vm2289_vm1, %v2288_v0 }
 0x14e   : > { %1952 = vmatmul.mubr.msk.bf16.vlgmr.msra.gmra.mxu0 %vm433_vm8, %v996_v42  ;;  %1941 = vmatprep.subr.bf16.mxu1 %v2288_v0 }
 0x14f   : > { %1967 = vmatprep.mubr.msk.bf16.mxu0 %vm2289_vm1, %v2288_v0  ;;  %1964 = vmatpush3.bf16.msra.mxu0 %v2119_v52 }
 0x150   : > { %1965 = vmatprep.subr.bf16.mxu0 %v2288_v0 }
 0x151   : > { %1942 = vmatpush3.bf16.msra.mxu1 %v2112_v43 }
 0x152   : > { %1955 = vmatprep.subr.bf16.mxu1 %v2288_v0 }
 0x153   : > { %1966 = vmatpush3.bf16.msra.mxu0 %v2122_v54 }
 0x154   : > { %1944 = vmatmul.mubr.msk.bf16.vlgmr.msra.gmra.mxu1 %vm433_vm8, %v921_v46  ;;  %1979 = vmatprep.subr.bf16.mxu0 %v2288_v0 }
 0x155   : > { %1956 = vmatpush3.bf16.msra.mxu1 %v2114_v45  ;;  %1959 = vmatprep.mubr.msk.bf16.mxu1 %vm2289_vm1, %v2288_v0  ;;  %v2123_v45 = vld [vmem:[#allocation8 + $0x30] sm:$0xff]  }
 0x156   : > { %1957 = vmatprep.subr.bf16.mxu1 %v2288_v0 }
 0x159   : > { %1958 = vmatpush3.bf16.msra.mxu1 %v2115_v47 }
 0x15a   : > { %1971 = vmatprep.subr.bf16.mxu1 %v2288_v0 }
 0x15c   : > { %1960 = vmatmul.mubr.msk.bf16.vlgmr.msra.gmra.mxu1 %vm433_vm8, %v1064_v50  ;;  %v2125_v50 = vld [vmem:[#allocation8 + $0x28] sm:$0xff]  }
 0x15d   : > { %1975 = vmatprep.mubr.msk.bf16.mxu1 %vm2289_vm1, %v2288_v0  ;;  %1972 = vmatpush3.bf16.msra.mxu1 %v2117_v51 }
 0x15e   : > { %1973 = vmatprep.subr.bf16.mxu1 %v2288_v0 }
 0x161   : > { %1974 = vmatpush3.bf16.msra.mxu1 %v2118_v53  ;;  %v2127_v53 = vld [vmem:[#allocation8 + $0x20] sm:$0xff]  }
 0x162   : > { %1987 = vmatprep.subr.bf16.mxu1 %v2288_v0 }
 0x205   : > { %v905_v55 = vpop.f32.mrf.mxu0 }
 0x207   : > { %v1937_v56 = vpop.f32.mrf.mxu0 }
 0x209   : > { %v908_v57 = vpop.f32.mrf.mxu0 }
 0x20b   : > { %v1938_v59 = vpop.f32.mrf.mxu0 }
 0x20c   : > { %v846_v58 = vpop.f32.mrf.mxu1 }
 0x20d   : > { %v906_v6 = vadd.f32 %v905_v55, %v846_v58  ;;  %v2129_v55 = vld [vmem:[#allocation8 + $0x48] sm:$0xff]  }
 0x20e   : > { %v1929_v60 = vpop.f32.mrf.mxu1  ;;  %v1046_v61 = vpop.f32.mrf.mxu0 }
 0x210   : > { %v849_v62 = vpop.f32.mrf.mxu1  ;;  %v1953_v63 = vpop.f32.mrf.mxu0 }
 0x211   : > { %v909_v11 = vadd.f32 %v908_v57, %v849_v62  ;;  %v2130_v57 = vld [vmem:[#allocation8 + $0x40] sm:$0xff]   ;;  %v2133_v62 = vld [vmem:[%s2632_s7] sm:$0xff]  }
 0x212   : > { %v1930_v2 = vpop.f32.mrf.mxu1  ;;  %v1049_v3 = vpop.f32.mrf.mxu0 }
 0x214   : > { %v971_v4 = vpop.f32.mrf.mxu1  ;;  %v1954_v5 = vpop.f32.mrf.mxu0 }
 0x215   : > { %v978_v9 = vadd.f32 %v971_v4, %v906_v6 }
 0x216   : > { %v1945_v7 = vpop.f32.mrf.mxu1 }
 0x217   : > { %v1053_v14 = vadd.f32 %v1046_v61, %v978_v9  ;;  %v2132_v61 = vld [vmem:[%s2632_s7 + $0x8] sm:$0xff]  }
 0x218   : > { %v974_v10 = vpop.f32.mrf.mxu1 }
 0x219   : > { %v979_v13 = vadd.f32 %v974_v10, %v909_v11 }
 0x21a   : > { %v1946_v12 = vpop.f32.mrf.mxu1 }
 0x21b   : > { %v1054_v20 = vadd.f32 %v1049_v3, %v979_v13 }
 0x21c   : > { %v1114_v15 = vpop.f32.mrf.mxu1 }
 0x21d   : > { %v1121_v17 = vadd.f32 %v1114_v15, %v1053_v14 }
 0x21e   : > { %v1961_v18 = vpop.f32.mrf.mxu1 }
 0x21f   : > { %v1130_v19 = vadd.f32 %v1785_v16, %v1121_v17 }
 0x220   : > { %v1117_v21 = vpop.f32.mrf.mxu1 }
 0x221   : > { %v1132_v22 = vmax.f32 %v1130_v19, 0.0  ;;  %v1122_v23 = vadd.f32 %v1117_v21, %v1054_v20 }
 0x222   : > { %v1962_v24 = vpop.f32.mrf.mxu1 }
 0x223   : > { %v1828_v25 = vpack.c.bf16 %v1132_v22, %v1132_v22  ;;  %v1131_v26 = vadd.f32 %v1785_v16, %v1122_v23  ;;  %v1808_v23 = vld [vmem:[%s2631_s6] ss:$0 sm:$0xff] }
 0x225   : > { %v1140_v27 = vrot.slane %v1828_v25, 7  ;;  %v1133_v28 = vmax.f32 %v1131_v26, 0.0 }
 0x227   : > { %1146 = vst.msk [vmem:[#allocation2] sm:$0xe] %vm393_vm5, %v1140_v27  ;;  %v1829_v29 = vpack.c.bf16 %v1133_v28, %v1133_v28  ;;  %v1141_v30 = vrot.slane %v1140_v27, 4 }
 0x229   : > { %v1142_v31 = vrot.slane %v1829_v29, 7 }
 0x22b   : > { %v1143_v32 = vsel %vm2456_vm6, %v1141_v30, %v1142_v31 }
 0x22c   : > { %1147 = vst.msk [vmem:[#allocation2 + $0x4] sm:$0x7] %vm395_vm7, %v1143_v32 }
 0x22e   : > { %v1148_v33 = vld [vmem:[#allocation2] sm:$0xf] }
 0x22f   : > { %v1287_v35 = vld [vmem:[#allocation2] sm:$0xe] }
 0x230   : > { %v1430_v58 = vld [vmem:[#allocation2] sm:$0xc] }
 0x233   : > { %v1149_v36 = vld [vmem:[#allocation2 + $0x4] sm:$0x3] }
 0x234   : > { %v1154_v37 = vld [vmem:[#allocation2 + $0x4] sm:$0x7]  ;;  %v1792_v39 = vcombine.low %v1148_v33, %v1149_v36 }
 0x235   : > { %v1355_v38 = vld [vmem:[#allocation2 + $0x4] sm:$0xf]  ;;  %v1788_v40 = vcombine.low %v1148_v33, %v1154_v37  ;;  %v1796_v54 = vcombine.low %v1287_v35, %v1154_v37 }
 0x236   : > { %v1800_v41 = vcombine.low %v1287_v35, %v1355_v38  ;;  %1976 = vmatmul.mubr.msk.bf16.vlgmr.msra.gmra.mxu1 %vm433_vm8, %v1792_v39  ;;  %v1804_v59 = vcombine.low %v1430_v58, %v1355_v38 }
 0x237   : > { %v1168_v42 = vshll.u32 %v1788_v40, 16  ;;  %1988 = vmatpush3.bf16.msra.mxu1 %v2121_v34  ;;  %1991 = vmatprep.mubr.msk.bf16.mxu1 %vm2289_vm1, %v2288_v0  ;;  %v1166_v46 = vshrl.u32 %v1788_v40, 16  ;;  %v1296_v56 = vrot.slane %v1796_v54, 1 }
 0x238   : > { %v1365_v43 = vshrl.u32 %v1800_v41, 16  ;;  %v1368_v44 = vshll.u32 %v1800_v41, 16  ;;  %1989 = vmatprep.subr.bf16.mxu1 %v2288_v0  ;;  %v1439_v60 = vrot.slane %v1804_v59, 2 }
 0x239   : > { %v1170_v47 = vrot.slane %v1168_v42, 1 }
 0x23a   : > { %v1367_v48 = vrot.slane %v1365_v43, 1  ;;  %v1370_v49 = vrot.slane %v1368_v44, 2 }
 0x23b   : > { %v1171_v51 = vor.u32 %v1170_v47, %v1166_v46  ;;  %1990 = vmatpush3.bf16.msra.mxu1 %v2123_v45 }
 0x23c   : > { %v1371_v52 = vor.u32 %v1370_v49, %v1367_v48  ;;  %2003 = vmatprep.subr.bf16.mxu1 %v2288_v0 }
 0x23d   : > { %1968 = vmatmul.mubr.msk.bf16.vlgmr.msra.gmra.mxu0 %vm433_vm8, %v1171_v51 }
 0x23e   : > { %1980 = vmatpush3.bf16.msra.mxu0 %v2125_v50  ;;  %1983 = vmatprep.mubr.msk.bf16.mxu0 %vm2289_vm1, %v2288_v0 }
 0x23f   : > { %1992 = vmatmul.mubr.msk.bf16.vlgmr.msra.gmra.mxu1 %vm433_vm8, %v1371_v52  ;;  %1981 = vmatprep.subr.bf16.mxu0 %v2288_v0 }
 0x240   : > { %2007 = vmatprep.mubr.msk.bf16.mxu1 %vm2289_vm1, %v2288_v0  ;;  %2004 = vmatpush3.bf16.msra.mxu1 %v2132_v61 }
 0x241   : > { %2005 = vmatprep.subr.bf16.mxu1 %v2288_v0 }
 0x242   : > { %1982 = vmatpush3.bf16.msra.mxu0 %v2127_v53 }
 0x243   : > { %1995 = vmatprep.subr.bf16.mxu0 %v2288_v0 }
 0x244   : > { %2006 = vmatpush3.bf16.msra.mxu1 %v2133_v62 }
 0x245   : > { %1984 = vmatmul.mubr.msk.bf16.vlgmr.msra.gmra.mxu0 %vm433_vm8, %v1296_v56 }
 0x246   : > { %1996 = vmatpush3.bf16.msra.mxu0 %v2129_v55  ;;  %1999 = vmatprep.mubr.msk.bf16.mxu0 %vm2289_vm1, %v2288_v0 }
 0x247   : > { %1997 = vmatprep.subr.bf16.mxu0 %v2288_v0 }
 0x24a   : > { %1998 = vmatpush3.bf16.msra.mxu0 %v2130_v57 }
 0x24d   : > { %2000 = vmatmul.mubr.msk.bf16.vlgmr.msra.gmra.mxu0 %vm433_vm8, %v1439_v60 }
 0x2f6   : > { %v1280_v63 = vpop.f32.mrf.mxu1 }
 0x2f8   : > { %v1977_v2 = vpop.f32.mrf.mxu1 }
 0x2fa   : > { %v1283_v3 = vpop.f32.mrf.mxu1 }
 0x2fc   : > { %v1978_v5 = vpop.f32.mrf.mxu1 }
 0x2fd   : > { %v1221_v4 = vpop.f32.mrf.mxu0 }
 0x2fe   : > { %v1281_v15 = vadd.f32 %v1280_v63, %v1221_v4 }
 0x2ff   : > { %v1969_v6 = vpop.f32.mrf.mxu0  ;;  %v1421_v7 = vpop.f32.mrf.mxu1 }
 0x301   : > { %v1224_v9 = vpop.f32.mrf.mxu0  ;;  %v1993_v10 = vpop.f32.mrf.mxu1 }
 0x302   : > { %v1284_v19 = vadd.f32 %v1283_v3, %v1224_v9 }
 0x303   : > { %v1970_v11 = vpop.f32.mrf.mxu0  ;;  %v1424_v12 = vpop.f32.mrf.mxu1 }
 0x305   : > { %v1346_v13 = vpop.f32.mrf.mxu0  ;;  %v1994_v14 = vpop.f32.mrf.mxu1 }
 0x306   : > { %v1353_v17 = vadd.f32 %v1346_v13, %v1281_v15 }
 0x307   : > { %v1985_v16 = vpop.f32.mrf.mxu0 }
 0x308   : > { %v1428_v21 = vadd.f32 %v1421_v7, %v1353_v17 }
 0x309   : > { %v1349_v18 = vpop.f32.mrf.mxu0 }
 0x30a   : > { %v1354_v20 = vadd.f32 %v1349_v18, %v1284_v19 }
 0x30b   : > { %v1986_v0 = vpop.f32.mrf.mxu0 }
 0x30c   : > { %v1429_v27 = vadd.f32 %v1424_v12, %v1354_v20 }
 0x30d   : > { %v1489_v22 = vpop.f32.mrf.mxu0 }
 0x30e   : > { %v1496_v24 = vadd.f32 %v1489_v22, %v1428_v21 }
 0x30f   : > { %v2001_v25 = vpop.f32.mrf.mxu0 }
 0x310   : > { %v1505_v26 = vadd.f32 %v1808_v23, %v1496_v24 }
 0x311   : > { %v1492_v28 = vpop.f32.mrf.mxu0 }
 0x312   : > { %v1507_v29 = vmax.f32 %v1505_v26, 0.0  ;;  %v1497_v30 = vadd.f32 %v1492_v28, %v1429_v27 }
 0x313   : > { %v2002_v31 = vpop.f32.mrf.mxu0 }
 0x314   : > { %v1830_v32 = vpack.c.bf16 %v1507_v29, %v1507_v29  ;;  %v1506_v33 = vadd.f32 %v1808_v23, %v1497_v30 }
 0x316   : > { %v1515_v34 = vrot.slane %v1830_v32, 7  ;;  %v1508_v35 = vmax.f32 %v1506_v33, 0.0 }
 0x318   : > { %1521 = vst.msk [vmem:[#allocation2] sm:$0xe] %vm393_vm5, %v1515_v34  ;;  %v1831_v36 = vpack.c.bf16 %v1508_v35, %v1508_v35  ;;  %v1516_v37 = vrot.slane %v1515_v34, 4 }
 0x31a   : > { %v1517_v38 = vrot.slane %v1831_v36, 7 }
 0x31c   : > { %v1518_v39 = vsel %vm2456_vm6, %v1516_v37, %v1517_v38 }
 0x31d   : > { %1522 = vst.msk [vmem:[#allocation2 + $0x4] sm:$0x7] %vm395_vm7, %v1518_v39 }
 0x324   : > { %v2134_v40 = vld [vmem:[#allocation2] sm:$0x7e]  }
 0x325   : > { %v1541_v41 = vrot.slane %v2134_v40, 1 }
 0x327   : > { %2008 = vmatmul.mubr.msk.bf16.vlgmr.msra.gmra.mxu1 %vm433_vm8, %v1541_v41 }
 0x3e7   : > { %v1591_v42 = vpop.f32.mrf.mxu1 }
 0x3e8   : > { %v1592_v43 = vadd.f32 %v1811_v8, %v1591_v42 }
 0x3e9   : > { %v2009_v44 = vpop.f32.mrf.mxu1 }
 0x3ea   : > { %v1832_v45 = vpack.c.bf16 %v1592_v43, %v1592_v43 }
 0x3eb   : > { %v1594_v46 = vpop.f32.mrf.mxu1 }
 0x3ec   : > { %v1595_v47 = vadd.f32 %v1811_v8, %v1594_v46  ;;  %1610 = vrot.lane.b32.xlu0 %v1832_v45, %s2291_s29  ;;  %1607 = vst.msk [vmem:[%s369_s16] sm:$0xf] %vm1606_vm10, %v1832_v45 }
 0x3ed   : > { %v2010_v48 = vpop.f32.mrf.mxu1 }
 0x3ee   : > { %v1833_v1 = vpack.c.bf16 %v1595_v47, %v1595_v47 }
 0x3f0   : > { %1612 = vrot.lane.b32.xlu0 %v1833_v1, %s2291_s29  ;;  %1609 = vst.msk [vmem:[%s369_s16 + $0x4] sm:$0x3] %vm1608_vm11, %v1833_v1 }
 0x45e   : > { %v1611_v49 = vpop.permute.xlu0 %1610 }
 0x45f   : > { %1818 = vst.msk [vmem:[%s369_s16 + $0x8] sm:$0xf] %vm1606_vm10, %v1611_v49 }
 0x462   : > { %v1613_v50 = vpop.permute.xlu0 %1612 }
 0x463   : > { %1819 = vst.msk [vmem:[%s369_s16 + $0xc] sm:$0x3] %vm1608_vm11, %v1613_v50 }
 0x464   : > { %2226 = shalt.err (!%p2223_p0)
}
 0x465   : > { %s2227_s28 = scalar_lea.hbm %s2579_s24, 256  ;;  %s2231_s22 = scalar_lea.hbm %s2634_s9, 512 }
 0x466   : > { %p2228_p6 = scmp.ne.s32.totalorder %s2579_s24, %s2227_s28  ;;  %p2232_p1 = scmp.lt.s32.totalorder %s2579_s24, %s2634_s9 }
 0x467   : > { %p2233_p5 = scmp.lt.s32.totalorder %s2231_s22, %s2227_s28 }
 0x468   : > { %p2229_p9 = pnand %p2228_p6, %p2647_p12 }
 0x469   : > { %p2234_p3 = por %p2233_p5, %p2232_p1 }
 0x46a   : > { %p2230_p13 = pneg %p2229_p9 }
 0x46c   : > { %p2235_p10 = pnand %p2234_p3, %p2230_p13 }
 0x46e   : > { %2238 = shalt.err (!%p2235_p10)
}
 0x46f   : > { %s2293_s14 = smov 4  }
 0x470   : > { %2023 = dma.vmem_to_hbm [thread:$0]  (%p2647_p12), %s2574_s23, 256, %s2579_s24, %s2583_s26, %s2291_s29, %s2291_s29, %s2293_s14  }
 0x471 PF: > { %p2045_p2 = scmp.ge.s32.totalorder %s2281_s12, 2  ;;  %s1651_s25 = sand.u32 1, %s2269_s30  }
 0x472   : > { %p2648_p4 = scmp.ne.s32.totalorder %s2638_s20, 0  ;;  %s1652_s27 = scalar_lea.sflag [#allocation5], %s1651_s25 }
 0x474   : > { %p2036_p7 = pnand %p2045_p2, %p2648_p4 }
 0x476   : > { %p2037_p8 = pneg %p2036_p7 }
 0x478   : > { %2264 = dma.done.wait (%p2037_p8), %s1652_s27, 256  }
 0x479   : > { %2266 = vsyncadd (%p2037_p8), %s1652_s27, 4294967040  ;;  %p21_p11 = scmp.ge.s32.totalorder %s2369_s15, 4   ;;  %s2649_s30 = smov %s2273_s10 }
 0x47a   : > { %s2650_s10 = smov %s2277_s11  ;;  %s2651_s11 = smov %s2380_s18 }
 0x47b   : > { %s2652_s12 = smov %s2369_s15  ;;  %23 = sbr.rel (!%p21_p11) target bundleno = 5 (0x5), region = 117 }
 0x480   :  { %1657 = vsyncpa [#allocation4], 1 }
 0x481   :  { %1659 = vsyncpa [#allocation4 + $0x1], 1 }
 0x482   :  { %1660 = vsyncpa [#allocation7], 1 }
 0x483   :  { %1661 = vsyncpa [#allocation5], 1 }
 0x484   :  { %1663 = vsyncpa [#allocation5 + $0x1], 1 }

</bundles_post_ra>
